<compile_context>
chip_gen: v5e
topology: v5e:2x2
jax: 0.10.0
libtpu: 0.0.40
codegen_flags: <defaults>
</compile_context>

<pallas_src>
import numpy as np
import jax
import jax.numpy as jnp
from jax.experimental import pallas as pl
from jax.experimental.pallas import tpu as pltpu


# ----------------------------- Pallas kernel ------------------------------- #

def _make_decoder_kernel(M, W0, Cout1, Cout2, Cout3, n_label, clamp_min):
    """M = B*H*W0 rows; every per-phase array is (M, C), width m = row % W0."""
    C1g, C2g, C3 = 2 * Cout1, 2 * Cout2, Cout3

    def kernel(x_ref, w1_ref, w2_ref, w3_ref, par_ref, out_ref):

        def mm(a, b):   # single-pass bf16 MXU matmul, f32 accumulation
            return jnp.dot(a.astype(jnp.bfloat16), b,
                           preferred_element_type=jnp.float32)

        # width-position boundary masks; row r = (b*H + h)*W0 + m
        pos = jax.lax.broadcasted_iota(jnp.int32, (M, 1), 0) % W0
        is_first = pos == 0
        is_last = pos == W0 - 1

        # +-1 width shifts: XLU sublane rotation + boundary zero-fill.  The
        # masked rows are exactly the (b, h)-group boundaries, so the rotate's
        # wraparound / cross-image rows never leak into the result.
        def prev(v):            # v[m-1]; 0 at m == 0
            return jnp.where(is_first, 0.0, pltpu.roll(v, 1, 0))

        def nxt(v):             # v[m+1]; 0 at m == W0-1
            return jnp.where(is_last, 0.0, pltpu.roll(v, M - 1, 0))

        x1 = x_ref[...]                          # (M, Cin1) bf16, [image|label]
        lab = x1[:, x1.shape[1] - n_label:]      # (M, n_label)

        def bn_gate(h, gamma, beta, c_out):
            # train-mode BatchNorm (two-pass variance, eps=1e-5) + gated sigmoid
            mean = jnp.mean(h, axis=0, keepdims=True)
            hc = h - mean
            var = jnp.mean(hc * hc, axis=0, keepdims=True)
            hn = hc * (jax.lax.rsqrt(var + 1e-5) * gamma) + beta
            return hn[:, :c_out] * jax.nn.sigmoid(hn[:, c_out:])

        # ---- layer 1: ConvT(1,4)/s2/p1 (polyphase) + BN + gate -------------
        #   even[m] = x[m]@W1 + x[m-1]@W3 ;   odd[m] = x[m]@W2 + x[m+1]@W0
        # (deconv bias omitted: cancelled exactly by the train-mode BN mean)
        t1 = mm(x1, w1_ref[...])                 # (M, 4*C1g), taps [W0|W1|W2|W3]
        c1 = lambda k: t1[:, k * C1g:(k + 1) * C1g]
        h1 = jnp.concatenate(
            [c1(1) + prev(c1(3)),                # even output phase
             c1(2) + nxt(c1(0))], axis=0)        # odd  output phase -> (2M, C1g)
        a1 = bn_gate(h1, par_ref[0:1, :C1g], par_ref[1:2, :C1g], Cout1)

        # ---- layer 2: same deconv on [even; odd] stacked rows --------------
        # 4 output width-phases:  S0 = E@V1 + prev(O@V3)   S1 = E@V2 + O@V0
        #                         S2 = O@V1 + E@V3         S3 = O@V2 + next(E@V0)
        # Label columns are added per tap *before* the shift, so boundary taps
        # drop their label contribution automatically (as in the reference).
        r2 = mm(a1, w2_ref[:Cout1, :])           # (2M, 4*C2g), rows [E; O]
        l2 = mm(lab, w2_ref[Cout1:, :])          # (M, 4*C2g)
        ev = lambda k: r2[0:M, k * C2g:(k + 1) * C2g] + l2[:, k * C2g:(k + 1) * C2g]
        ov = lambda k: r2[M:2 * M, k * C2g:(k + 1) * C2g] + l2[:, k * C2g:(k + 1) * C2g]
        h2 = jnp.concatenate(
            [ev(1) + prev(ov(3)),
             ev(2) + ov(0),
             ov(1) + ev(3),
             ov(2) + nxt(ev(0))], axis=0)        # (4M, C2g), rows [S0;S1;S2;S3]
        a2 = bn_gate(h2, par_ref[2:3, :C2g], par_ref[3:4, :C2g], Cout2)

        # ---- layer 3: ConvT(1,5)/s1/p2 + bias + clamp ----------------------
        r3 = mm(a2, w3_ref[:Cout2, :])           # (4M, 5*C3), taps [U0..U4]
        l3 = mm(lab, w3_ref[Cout2:, :])          # (M, 5*C3)
        T = lambda j, k: (r3[j * M:(j + 1) * M, k * C3:(k + 1) * C3]
                          + l3[:, k * C3:(k + 1) * C3])
        b3 = par_ref[4:5, :C3]
        p0 = T(0, 2) + T(1, 1) + T(2, 0) + prev(T(2, 4) + T(3, 3)) + b3
        p1 = T(0, 3) + T(1, 2) + T(2, 1) + T(3, 0) + prev(T(3, 4)) + b3
        p2 = T(0, 4) + T(1, 3) + T(2, 2) + T(3, 1) + nxt(T(0, 0)) + b3
        p3 = T(1, 4) + T(2, 3) + T(3, 2) + nxt(T(0, 1) + T(1, 0)) + b3

        # lane-dense (M, 4*C3) output: out[r, j*C3 + c] == y_nchw[b, c, h, 4m+j]
        out_ref[...] = jnp.maximum(
            jnp.concatenate([p0, p1, p2, p3], axis=1), clamp_min)

    return kernel


# ------------------------------ JAX wrapper -------------------------------- #

def prepare_decoder_params(params):
    """One-time parameter packing (hoisted out of the per-call path).

    One bf16 tap-slab per layer (taps stacked along the output-channel axis,
    rows = [image channels | label channels]) plus one small f32 slab with
    [gamma1; beta1; gamma2; beta2; bias3].  The deconv1/deconv2 biases are
    dropped: a per-channel bias before train-mode BatchNorm is exactly
    cancelled by the mean subtraction.
    """
    w1, _, g1, be1 = params["deconv1"]
    w2, _, g2, be2 = params["deconv2"]
    w3, b3 = params["deconv3"]

    def taps(w):                                 # (Cin, C, 1, K) -> (Cin, K*C)
        return jnp.concatenate([w[:, :, 0, k] for k in range(w.shape[3])],
                               axis=1).astype(jnp.bfloat16)

    C1g, C2g, C3 = w1.shape[1], w2.shape[1], w3.shape[1]
    P = max(C1g, C2g, C3)
    par = jnp.zeros((5, P), jnp.float32)
    par = par.at[0, :C1g].set(g1).at[1, :C1g].set(be1)
    par = par.at[2, :C2g].set(g2).at[3, :C2g].set(be2)
    par = par.at[4, :C3].set(b3)
    return {"w1": taps(w1), "w2": taps(w2), "w3": taps(w3), "par": par}


def decoder_forward(z, l, prep, out_type="1D"):
    """Fused Pallas forward of Decoder (training-mode BatchNorm)."""
    B, Cz, H, W0 = z.shape
    n_label = l.shape[1]
    M = B * H * W0
    C1g = prep["w1"].shape[1] // 4
    C2g = prep["w2"].shape[1] // 4
    C3 = prep["w3"].shape[1] // 5
    Cout1, Cout2 = C1g // 2, C2g // 2

    # layer-1 input rows, channels-last: [image | per-batch label broadcast]
    x_img = jnp.transpose(z, (0, 2, 3, 1)).reshape(M, Cz)
    lab = jnp.broadcast_to(l[:, None, :], (B, H * W0, n_label)).reshape(M, n_label)
    x1 = jnp.concatenate([x_img, lab], axis=-1).astype(jnp.bfloat16)

    kernel = _make_decoder_kernel(M, W0, Cout1, Cout2, C3, n_label,
                                  clamp_min=-80.0)
    vmem = pl.BlockSpec(memory_space=pltpu.MemorySpace.VMEM)
    out = pl.pallas_call(
        kernel,
        out_shape=jax.ShapeDtypeStruct((M, 4 * C3), jnp.float32),
        in_specs=[vmem] * 5,
        out_specs=vmem,
    )(x1, prep["w1"], prep["w2"], prep["w3"], prep["par"])

    # out[(b*H+h)*W0 + m, j*C3 + c] == y_nchw[b, c, h, 4*m + j]
    y = (out.reshape(B, H, W0, 4, C3)
            .transpose(0, 1, 4, 2, 3)
            .reshape(B, H, C3, 4 * W0))
    if out_type == "1D":
        return y                       # == NCHW result permuted (0, 2, 1, 3)
    return jnp.transpose(y, (0, 2, 1, 3))


def concat_xy(x, y):
    B, C, H, W = x.shape
    yb = jnp.broadcast_to(y[:, :, None, None], (B, y.shape[1], H, W))
    return jnp.concatenate([x, yb], axis=1)


# ---------------------- pure-JAX reference (for checking) ------------------ #

def _ref_conv_transpose_w(x, w, b, stride, pad):
    B, Cin, H, W = x.shape
    Cout, K = w.shape[1], w.shape[3]
    Wout = (W - 1) * stride - 2 * pad + K
    y = jnp.zeros((B, Cout, H, Wout), jnp.float32)
    for wi in range(W):
        contrib = jnp.einsum("bih,iok->bohk", x[:, :, :, wi], w[:, :, 0, :],
                             precision=jax.lax.Precision.HIGHEST)
        for k in range(K):
            wo = wi * stride + k - pad
            if 0 <= wo < Wout:
                y = y.at[:, :, :, wo].add(contrib[:, :, :, k])
    return y + b[None, :, None, None]


def _ref_gated_deconv(x, w, b, gamma, beta, stride, pad):
    h = _ref_conv_transpose_w(x, w, b, stride, pad)
    mean = h.mean(axis=(0, 2, 3), keepdims=True)
    var = ((h - mean) ** 2).mean(axis=(0, 2, 3), keepdims=True)
    h = (h - mean) / jnp.sqrt(var + 1e-5)
    h = h * gamma[None, :, None, None] + beta[None, :, None, None]
    C = h.shape[1] // 2
    return h[:, :C] * jax.nn.sigmoid(h[:, C:])


def decoder_reference(z, l, params, out_type="1D"):
    w1, b1, g1, be1 = params["deconv1"]
    w2, b2, g2, be2 = params["deconv2"]
    w3, b3 = params["deconv3"]
    h = _ref_gated_deconv(concat_xy(z, l), w1, b1, g1, be1, 2, 1)
    h = _ref_gated_deconv(concat_xy(h, l), w2, b2, g2, be2, 2, 1)
    h = _ref_conv_transpose_w(concat_xy(h, l), w3, b3, 1, 2)
    if out_type == "1D":
        h = jnp.transpose(h, (0, 2, 1, 3))
    return jnp.clip(h, -80.0, None)


# --------------------------------- main ------------------------------------ #

if __name__ == "__main__":
    n_freq, n_label = 32, 4
    B, H, W = 2, 1, 8

    key = jax.random.PRNGKey(0)
    ks = jax.random.split(key, 10)

    z = jax.random.normal(ks[0], (B, n_freq // 8, H, W), jnp.float32)
    l = jax.random.normal(ks[1], (B, n_label), jnp.float32)

    c1_in = n_freq // 8 + n_label
    c1_out = n_freq // 4
    c2_in = n_freq // 4 + n_label
    c2_out = n_freq // 2
    c3_in = n_freq // 2 + n_label

    params = {
        # GatedDeconv2D: ConvTranspose2d(in, 2*out, (1,4), (1,2), (0,1));
        # weight ~ N(0,1), bias = 0 (as in the module __init__); BN affine.
        "deconv1": (
            jax.random.normal(ks[2], (c1_in, 2 * c1_out, 1, 4), jnp.float32),
            jnp.zeros((2 * c1_out,), jnp.float32),
            1.0 + 0.1 * jax.random.normal(ks[3], (2 * c1_out,), jnp.float32),
            0.1 * jax.random.normal(ks[4], (2 * c1_out,), jnp.float32),
        ),
        "deconv2": (
            jax.random.normal(ks[5], (c2_in, 2 * c2_out, 1, 4), jnp.float32),
            jnp.zeros((2 * c2_out,), jnp.float32),
            1.0 + 0.1 * jax.random.normal(ks[6], (2 * c2_out,), jnp.float32),
            0.1 * jax.random.normal(ks[7], (2 * c2_out,), jnp.float32),
        ),
        # deconv3: ConvTranspose2d(in, n_freq, (1,5), (1,1), (0,2))
        "deconv3": (
            0.1 * jax.random.normal(ks[8], (c3_in, n_freq, 1, 5), jnp.float32),
            0.1 * jax.random.normal(ks[9], (n_freq,), jnp.float32),
        ),
    }

    prep = prepare_decoder_params(params)        # one-time packing (hoisted)
    decoder_fn = jax.jit(decoder_forward, static_argnames=("out_type",))
    out = decoder_fn(z, l, prep)
    out = jax.block_until_ready(out)

    # shape: permute(0,2,1,3) of (B, n_freq, H, 4W) -> (B, H, n_freq, 4W)
    assert out.shape == (B, H, n_freq, 4 * W), out.shape

    ref = np.asarray(decoder_reference(z, l, params))
    got = np.asarray(out)
    err = np.max(np.abs(got - ref))
    scale = np.max(np.abs(ref)) + 1e-6
    # tolerance accounts for explicit bf16 MXU inputs vs HIGHEST-f32 reference
    assert err <= 3e-2 * scale, (err, scale)

    print("KERNEL_OK")
</pallas_src>

<mosaic_0001>
module attributes {stable_mosaic.version = 11 : i64} {
  func.func @kernel(%arg0: memref<16x8xbf16, #tpu.memory_space<vmem>>, %arg1: memref<8x64xbf16, #tpu.memory_space<vmem>>, %arg2: memref<12x128xbf16, #tpu.memory_space<vmem>>, %arg3: memref<20x160xbf16, #tpu.memory_space<vmem>>, %arg4: memref<5x32xf32, #tpu.memory_space<vmem>>, %arg5: memref<16x128xf32, #tpu.memory_space<vmem>>) attributes {dimension_semantics = [], scalar_prefetch = 0 : i64, scratch_operands = 0 : i64, tpu.core_type = #tpu.core_type<tc>} {
    %0 = tpu.iota {dimensions = array<i32: 0>} : vector<16x1xi32>
    %c8_i32 = arith.constant 8 : i32
    %c0_i32 = arith.constant 0 : i32
    %1 = arith.cmpi eq, %c8_i32, %c0_i32 : i32
    %c1_i32 = arith.constant 1 : i32
    %2 = arith.select %1, %c1_i32, %c8_i32 : i32
    %3 = vector.broadcast %2 : i32 to vector<16x1xi32>
    %4 = arith.remsi %0, %3 : vector<16x1xi32>
    %c0_i32_0 = arith.constant 0 : i32
    %5 = vector.broadcast %c0_i32_0 : i32 to vector<16x1xi32>
    %6 = arith.cmpi ne, %4, %5 : vector<16x1xi32>
    %c0_i32_1 = arith.constant 0 : i32
    %7 = vector.broadcast %c0_i32_1 : i32 to vector<16x1xi32>
    %8 = arith.cmpi slt, %4, %7 : vector<16x1xi32>
    %c0_i32_2 = arith.constant 0 : i32
    %9 = arith.cmpi slt, %2, %c0_i32_2 : i32
    %10 = vector.broadcast %9 : i1 to vector<16x1xi1>
    %11 = vector.broadcast %10 : vector<16x1xi1> to vector<16x1xi1>
    %12 = arith.xori %8, %11 : vector<16x1xi1>
    %13 = arith.andi %12, %6 : vector<16x1xi1>
    %14 = vector.broadcast %2 : i32 to vector<16x1xi32>
    %15 = arith.addi %4, %14 : vector<16x1xi32>
    %16 = arith.select %13, %15, %4 : vector<16x1xi1>, vector<16x1xi32>
    %c0_i32_3 = arith.constant 0 : i32
    %17 = vector.broadcast %c0_i32_3 : i32 to vector<16x1xi32>
    %18 = arith.cmpi eq, %16, %17 : vector<16x1xi32>
    %c7_i32 = arith.constant 7 : i32
    %19 = vector.broadcast %c7_i32 : i32 to vector<16x1xi32>
    %20 = arith.cmpi eq, %16, %19 : vector<16x1xi32>
    %c0 = arith.constant 0 : index
    %c0_4 = arith.constant 0 : index
    %21 = vector.load %arg0[%c0, %c0_4] : memref<16x8xbf16, #tpu.memory_space<vmem>>, vector<16x8xbf16>
    %22 = vector.extract_strided_slice %21 {offsets = [0, 4], sizes = [16, 4], strides = [1, 1]} : vector<16x8xbf16> to vector<16x4xbf16>
    %c0_5 = arith.constant 0 : index
    %c0_6 = arith.constant 0 : index
    %23 = vector.load %arg1[%c0_5, %c0_6] : memref<8x64xbf16, #tpu.memory_space<vmem>>, vector<8x64xbf16>
    %cst = arith.constant dense<0.000000e+00> : vector<16x64xf32>
    %24 = tpu.matmul %21, %23, %cst {dimension_numbers = #tpu.dot_dimension_numbers<[1], [0], [0], [1], [0, 0, 1, 1], [], []>} : vector<16x8xbf16>, vector<8x64xbf16>, vector<16x64xf32> -> vector<16x64xf32>
    %25 = vector.extract_strided_slice %24 {offsets = [0, 16], sizes = [16, 16], strides = [1, 1]} : vector<16x64xf32> to vector<16x16xf32>
    %26 = vector.extract_strided_slice %24 {offsets = [0, 48], sizes = [16, 16], strides = [1, 1]} : vector<16x64xf32> to vector<16x16xf32>
    %c1_i32_7 = arith.constant 1 : i32
    %27 = tpu.dynamic_rotate %26 by %c1_i32_7 dim 0 : vector<16x16xf32>, i32 -> vector<16x16xf32>
    %cst_8 = arith.constant 0.000000e+00 : f32
    %28 = vector.shape_cast %18 : vector<16x1xi1> to vector<16x1xi1>
    %29 = vector.broadcast %28 : vector<16x1xi1> to vector<16x16xi1>
    %30 = vector.broadcast %cst_8 : f32 to vector<16x16xf32>
    %31 = arith.select %29, %30, %27 : vector<16x16xi1>, vector<16x16xf32>
    %32 = arith.addf %25, %31 : vector<16x16xf32>
    %33 = vector.extract_strided_slice %24 {offsets = [0, 32], sizes = [16, 16], strides = [1, 1]} : vector<16x64xf32> to vector<16x16xf32>
    %34 = vector.extract_strided_slice %24 {offsets = [0, 0], sizes = [16, 16], strides = [1, 1]} : vector<16x64xf32> to vector<16x16xf32>
    %c15_i32 = arith.constant 15 : i32
    %35 = tpu.dynamic_rotate %34 by %c15_i32 dim 0 : vector<16x16xf32>, i32 -> vector<16x16xf32>
    %cst_9 = arith.constant 0.000000e+00 : f32
    %36 = vector.shape_cast %20 : vector<16x1xi1> to vector<16x1xi1>
    %37 = vector.broadcast %36 : vector<16x1xi1> to vector<16x16xi1>
    %38 = vector.broadcast %cst_9 : f32 to vector<16x16xf32>
    %39 = arith.select %37, %38, %35 : vector<16x16xi1>, vector<16x16xf32>
    %40 = arith.addf %33, %39 : vector<16x16xf32>
    %41 = tpu.concatenate %32, %40 in 0 : vector<16x16xf32>, vector<16x16xf32> -> vector<32x16xf32>
    %c0_10 = arith.constant 0 : index
    %c0_11 = arith.constant 0 : index
    %42 = vector.load %arg4[%c0_10, %c0_11] : memref<5x32xf32, #tpu.memory_space<vmem>>, vector<1x16xf32>
    %c1 = arith.constant 1 : index
    %c0_12 = arith.constant 0 : index
    %43 = vector.load %arg4[%c1, %c0_12] : memref<5x32xf32, #tpu.memory_space<vmem>>, vector<1x16xf32>
    %cst_13 = arith.constant dense<0.000000e+00> : vector<16xf32>
    %44 = vector.multi_reduction <add>, %41, %cst_13 [0] : vector<32x16xf32> to vector<16xf32>
    %45 = vector.shape_cast %44 : vector<16xf32> to vector<1x16xf32>
    %cst_14 = arith.constant 3.200000e+01 : f32
    %46 = vector.broadcast %cst_14 : f32 to vector<1x16xf32>
    %47 = arith.divf %45, %46 : vector<1x16xf32>
    %48 = vector.broadcast %47 : vector<1x16xf32> to vector<32x16xf32>
    %49 = arith.subf %41, %48 : vector<32x16xf32>
    %50 = arith.mulf %49, %49 : vector<32x16xf32>
    %cst_15 = arith.constant dense<0.000000e+00> : vector<16xf32>
    %51 = vector.multi_reduction <add>, %50, %cst_15 [0] : vector<32x16xf32> to vector<16xf32>
    %52 = vector.shape_cast %51 : vector<16xf32> to vector<1x16xf32>
    %cst_16 = arith.constant 3.200000e+01 : f32
    %53 = vector.broadcast %cst_16 : f32 to vector<1x16xf32>
    %54 = arith.divf %52, %53 : vector<1x16xf32>
    %cst_17 = arith.constant 9.99999974E-6 : f32
    %55 = vector.broadcast %cst_17 : f32 to vector<1x16xf32>
    %56 = arith.addf %54, %55 : vector<1x16xf32>
    %57 = math.rsqrt %56 : vector<1x16xf32>
    %58 = arith.mulf %57, %42 : vector<1x16xf32>
    %59 = vector.broadcast %58 : vector<1x16xf32> to vector<32x16xf32>
    %60 = arith.mulf %49, %59 : vector<32x16xf32>
    %61 = vector.broadcast %43 : vector<1x16xf32> to vector<32x16xf32>
    %62 = arith.addf %60, %61 : vector<32x16xf32>
    %63 = vector.extract_strided_slice %62 {offsets = [0, 0], sizes = [32, 8], strides = [1, 1]} : vector<32x16xf32> to vector<32x8xf32>
    %64 = vector.extract_strided_slice %62 {offsets = [0, 8], sizes = [32, 8], strides = [1, 1]} : vector<32x16xf32> to vector<32x8xf32>
    %65 = arith.negf %64 : vector<32x8xf32>
    %66 = math.exp %65 : vector<32x8xf32>
    %cst_18 = arith.constant 1.000000e+00 : f32
    %67 = vector.broadcast %cst_18 : f32 to vector<32x8xf32>
    %68 = arith.addf %67, %66 : vector<32x8xf32>
    %69 = arith.divf %67, %68 : vector<32x8xf32>
    %70 = arith.mulf %63, %69 : vector<32x8xf32>
    %c0_19 = arith.constant 0 : index
    %c0_20 = arith.constant 0 : index
    %71 = vector.load %arg2[%c0_19, %c0_20] : memref<12x128xbf16, #tpu.memory_space<vmem>>, vector<8x128xbf16>
    %72 = arith.truncf %70 : vector<32x8xf32> to vector<32x8xbf16>
    %cst_21 = arith.constant dense<0.000000e+00> : vector<32x128xf32>
    %73 = tpu.matmul %72, %71, %cst_21 {dimension_numbers = #tpu.dot_dimension_numbers<[1], [0], [0], [1], [0, 0, 1, 1], [], []>} : vector<32x8xbf16>, vector<8x128xbf16>, vector<32x128xf32> -> vector<32x128xf32>
    %c8 = arith.constant 8 : index
    %c0_22 = arith.constant 0 : index
    %74 = vector.load %arg2[%c8, %c0_22] : memref<12x128xbf16, #tpu.memory_space<vmem>>, vector<4x128xbf16>
    %cst_23 = arith.constant dense<0.000000e+00> : vector<16x128xf32>
    %75 = tpu.matmul %22, %74, %cst_23 {dimension_numbers = #tpu.dot_dimension_numbers<[1], [0], [0], [1], [0, 0, 1, 1], [], []>} : vector<16x4xbf16>, vector<4x128xbf16>, vector<16x128xf32> -> vector<16x128xf32>
    %76 = vector.extract_strided_slice %73 {offsets = [0, 32], sizes = [16, 32], strides = [1, 1]} : vector<32x128xf32> to vector<16x32xf32>
    %77 = vector.extract_strided_slice %75 {offsets = [0, 32], sizes = [16, 32], strides = [1, 1]} : vector<16x128xf32> to vector<16x32xf32>
    %78 = arith.addf %76, %77 : vector<16x32xf32>
    %79 = vector.extract_strided_slice %73 {offsets = [16, 96], sizes = [16, 32], strides = [1, 1]} : vector<32x128xf32> to vector<16x32xf32>
    %80 = vector.extract_strided_slice %75 {offsets = [0, 96], sizes = [16, 32], strides = [1, 1]} : vector<16x128xf32> to vector<16x32xf32>
    %81 = arith.addf %79, %80 : vector<16x32xf32>
    %c1_i32_24 = arith.constant 1 : i32
    %82 = tpu.dynamic_rotate %81 by %c1_i32_24 dim 0 : vector<16x32xf32>, i32 -> vector<16x32xf32>
    %cst_25 = arith.constant 0.000000e+00 : f32
    %83 = vector.shape_cast %18 : vector<16x1xi1> to vector<16x1xi1>
    %84 = vector.broadcast %83 : vector<16x1xi1> to vector<16x32xi1>
    %85 = vector.broadcast %cst_25 : f32 to vector<16x32xf32>
    %86 = arith.select %84, %85, %82 : vector<16x32xi1>, vector<16x32xf32>
    %87 = arith.addf %78, %86 : vector<16x32xf32>
    %88 = vector.extract_strided_slice %73 {offsets = [0, 64], sizes = [16, 32], strides = [1, 1]} : vector<32x128xf32> to vector<16x32xf32>
    %89 = vector.extract_strided_slice %75 {offsets = [0, 64], sizes = [16, 32], strides = [1, 1]} : vector<16x128xf32> to vector<16x32xf32>
    %90 = arith.addf %88, %89 : vector<16x32xf32>
    %91 = vector.extract_strided_slice %73 {offsets = [16, 0], sizes = [16, 32], strides = [1, 1]} : vector<32x128xf32> to vector<16x32xf32>
    %92 = vector.extract_strided_slice %75 {offsets = [0, 0], sizes = [16, 32], strides = [1, 1]} : vector<16x128xf32> to vector<16x32xf32>
    %93 = arith.addf %91, %92 : vector<16x32xf32>
    %94 = arith.addf %90, %93 : vector<16x32xf32>
    %95 = vector.extract_strided_slice %73 {offsets = [16, 32], sizes = [16, 32], strides = [1, 1]} : vector<32x128xf32> to vector<16x32xf32>
    %96 = vector.extract_strided_slice %75 {offsets = [0, 32], sizes = [16, 32], strides = [1, 1]} : vector<16x128xf32> to vector<16x32xf32>
    %97 = arith.addf %95, %96 : vector<16x32xf32>
    %98 = vector.extract_strided_slice %73 {offsets = [0, 96], sizes = [16, 32], strides = [1, 1]} : vector<32x128xf32> to vector<16x32xf32>
    %99 = vector.extract_strided_slice %75 {offsets = [0, 96], sizes = [16, 32], strides = [1, 1]} : vector<16x128xf32> to vector<16x32xf32>
    %100 = arith.addf %98, %99 : vector<16x32xf32>
    %101 = arith.addf %97, %100 : vector<16x32xf32>
    %102 = vector.extract_strided_slice %73 {offsets = [16, 64], sizes = [16, 32], strides = [1, 1]} : vector<32x128xf32> to vector<16x32xf32>
    %103 = vector.extract_strided_slice %75 {offsets = [0, 64], sizes = [16, 32], strides = [1, 1]} : vector<16x128xf32> to vector<16x32xf32>
    %104 = arith.addf %102, %103 : vector<16x32xf32>
    %105 = vector.extract_strided_slice %73 {offsets = [0, 0], sizes = [16, 32], strides = [1, 1]} : vector<32x128xf32> to vector<16x32xf32>
    %106 = vector.extract_strided_slice %75 {offsets = [0, 0], sizes = [16, 32], strides = [1, 1]} : vector<16x128xf32> to vector<16x32xf32>
    %107 = arith.addf %105, %106 : vector<16x32xf32>
    %c15_i32_26 = arith.constant 15 : i32
    %108 = tpu.dynamic_rotate %107 by %c15_i32_26 dim 0 : vector<16x32xf32>, i32 -> vector<16x32xf32>
    %cst_27 = arith.constant 0.000000e+00 : f32
    %109 = vector.shape_cast %20 : vector<16x1xi1> to vector<16x1xi1>
    %110 = vector.broadcast %109 : vector<16x1xi1> to vector<16x32xi1>
    %111 = vector.broadcast %cst_27 : f32 to vector<16x32xf32>
    %112 = arith.select %110, %111, %108 : vector<16x32xi1>, vector<16x32xf32>
    %113 = arith.addf %104, %112 : vector<16x32xf32>
    %114 = tpu.concatenate %87, %94, %101, %113 in 0 : vector<16x32xf32>, vector<16x32xf32>, vector<16x32xf32>, vector<16x32xf32> -> vector<64x32xf32>
    %c2 = arith.constant 2 : index
    %c0_28 = arith.constant 0 : index
    %115 = vector.load %arg4[%c2, %c0_28] : memref<5x32xf32, #tpu.memory_space<vmem>>, vector<1x32xf32>
    %c3 = arith.constant 3 : index
    %c0_29 = arith.constant 0 : index
    %116 = vector.load %arg4[%c3, %c0_29] : memref<5x32xf32, #tpu.memory_space<vmem>>, vector<1x32xf32>
    %cst_30 = arith.constant dense<0.000000e+00> : vector<32xf32>
    %117 = vector.multi_reduction <add>, %114, %cst_30 [0] : vector<64x32xf32> to vector<32xf32>
    %118 = vector.shape_cast %117 : vector<32xf32> to vector<1x32xf32>
    %cst_31 = arith.constant 6.400000e+01 : f32
    %119 = vector.broadcast %cst_31 : f32 to vector<1x32xf32>
    %120 = arith.divf %118, %119 : vector<1x32xf32>
    %121 = vector.broadcast %120 : vector<1x32xf32> to vector<64x32xf32>
    %122 = arith.subf %114, %121 : vector<64x32xf32>
    %123 = arith.mulf %122, %122 : vector<64x32xf32>
    %cst_32 = arith.constant dense<0.000000e+00> : vector<32xf32>
    %124 = vector.multi_reduction <add>, %123, %cst_32 [0] : vector<64x32xf32> to vector<32xf32>
    %125 = vector.shape_cast %124 : vector<32xf32> to vector<1x32xf32>
    %cst_33 = arith.constant 6.400000e+01 : f32
    %126 = vector.broadcast %cst_33 : f32 to vector<1x32xf32>
    %127 = arith.divf %125, %126 : vector<1x32xf32>
    %cst_34 = arith.constant 9.99999974E-6 : f32
    %128 = vector.broadcast %cst_34 : f32 to vector<1x32xf32>
    %129 = arith.addf %127, %128 : vector<1x32xf32>
    %130 = math.rsqrt %129 : vector<1x32xf32>
    %131 = arith.mulf %130, %115 : vector<1x32xf32>
    %132 = vector.broadcast %131 : vector<1x32xf32> to vector<64x32xf32>
    %133 = arith.mulf %122, %132 : vector<64x32xf32>
    %134 = vector.broadcast %116 : vector<1x32xf32> to vector<64x32xf32>
    %135 = arith.addf %133, %134 : vector<64x32xf32>
    %136 = vector.extract_strided_slice %135 {offsets = [0, 0], sizes = [64, 16], strides = [1, 1]} : vector<64x32xf32> to vector<64x16xf32>
    %137 = vector.extract_strided_slice %135 {offsets = [0, 16], sizes = [64, 16], strides = [1, 1]} : vector<64x32xf32> to vector<64x16xf32>
    %138 = arith.negf %137 : vector<64x16xf32>
    %139 = math.exp %138 : vector<64x16xf32>
    %cst_35 = arith.constant 1.000000e+00 : f32
    %140 = vector.broadcast %cst_35 : f32 to vector<64x16xf32>
    %141 = arith.addf %140, %139 : vector<64x16xf32>
    %142 = arith.divf %140, %141 : vector<64x16xf32>
    %143 = arith.mulf %136, %142 : vector<64x16xf32>
    %c0_36 = arith.constant 0 : index
    %c0_37 = arith.constant 0 : index
    %144 = vector.load %arg3[%c0_36, %c0_37] : memref<20x160xbf16, #tpu.memory_space<vmem>>, vector<16x160xbf16>
    %145 = arith.truncf %143 : vector<64x16xf32> to vector<64x16xbf16>
    %cst_38 = arith.constant dense<0.000000e+00> : vector<64x160xf32>
    %146 = tpu.matmul %145, %144, %cst_38 {dimension_numbers = #tpu.dot_dimension_numbers<[1], [0], [0], [1], [0, 0, 1, 1], [], []>} : vector<64x16xbf16>, vector<16x160xbf16>, vector<64x160xf32> -> vector<64x160xf32>
    %c16 = arith.constant 16 : index
    %c0_39 = arith.constant 0 : index
    %147 = vector.load %arg3[%c16, %c0_39] : memref<20x160xbf16, #tpu.memory_space<vmem>>, vector<4x160xbf16>
    %cst_40 = arith.constant dense<0.000000e+00> : vector<16x160xf32>
    %148 = tpu.matmul %22, %147, %cst_40 {dimension_numbers = #tpu.dot_dimension_numbers<[1], [0], [0], [1], [0, 0, 1, 1], [], []>} : vector<16x4xbf16>, vector<4x160xbf16>, vector<16x160xf32> -> vector<16x160xf32>
    %c4 = arith.constant 4 : index
    %c0_41 = arith.constant 0 : index
    %149 = vector.load %arg4[%c4, %c0_41] : memref<5x32xf32, #tpu.memory_space<vmem>>, vector<1x32xf32>
    %150 = vector.extract_strided_slice %146 {offsets = [0, 64], sizes = [16, 32], strides = [1, 1]} : vector<64x160xf32> to vector<16x32xf32>
    %151 = vector.extract_strided_slice %148 {offsets = [0, 64], sizes = [16, 32], strides = [1, 1]} : vector<16x160xf32> to vector<16x32xf32>
    %152 = arith.addf %150, %151 : vector<16x32xf32>
    %153 = vector.extract_strided_slice %146 {offsets = [16, 32], sizes = [16, 32], strides = [1, 1]} : vector<64x160xf32> to vector<16x32xf32>
    %154 = vector.extract_strided_slice %148 {offsets = [0, 32], sizes = [16, 32], strides = [1, 1]} : vector<16x160xf32> to vector<16x32xf32>
    %155 = arith.addf %153, %154 : vector<16x32xf32>
    %156 = arith.addf %152, %155 : vector<16x32xf32>
    %157 = vector.extract_strided_slice %146 {offsets = [32, 0], sizes = [16, 32], strides = [1, 1]} : vector<64x160xf32> to vector<16x32xf32>
    %158 = vector.extract_strided_slice %148 {offsets = [0, 0], sizes = [16, 32], strides = [1, 1]} : vector<16x160xf32> to vector<16x32xf32>
    %159 = arith.addf %157, %158 : vector<16x32xf32>
    %160 = arith.addf %156, %159 : vector<16x32xf32>
    %161 = vector.extract_strided_slice %146 {offsets = [32, 128], sizes = [16, 32], strides = [1, 1]} : vector<64x160xf32> to vector<16x32xf32>
    %162 = vector.extract_strided_slice %148 {offsets = [0, 128], sizes = [16, 32], strides = [1, 1]} : vector<16x160xf32> to vector<16x32xf32>
    %163 = arith.addf %161, %162 : vector<16x32xf32>
    %164 = vector.extract_strided_slice %146 {offsets = [48, 96], sizes = [16, 32], strides = [1, 1]} : vector<64x160xf32> to vector<16x32xf32>
    %165 = vector.extract_strided_slice %148 {offsets = [0, 96], sizes = [16, 32], strides = [1, 1]} : vector<16x160xf32> to vector<16x32xf32>
    %166 = arith.addf %164, %165 : vector<16x32xf32>
    %167 = arith.addf %163, %166 : vector<16x32xf32>
    %c1_i32_42 = arith.constant 1 : i32
    %168 = tpu.dynamic_rotate %167 by %c1_i32_42 dim 0 : vector<16x32xf32>, i32 -> vector<16x32xf32>
    %cst_43 = arith.constant 0.000000e+00 : f32
    %169 = vector.shape_cast %18 : vector<16x1xi1> to vector<16x1xi1>
    %170 = vector.broadcast %169 : vector<16x1xi1> to vector<16x32xi1>
    %171 = vector.broadcast %cst_43 : f32 to vector<16x32xf32>
    %172 = arith.select %170, %171, %168 : vector<16x32xi1>, vector<16x32xf32>
    %173 = arith.addf %160, %172 : vector<16x32xf32>
    %174 = vector.broadcast %149 : vector<1x32xf32> to vector<16x32xf32>
    %175 = arith.addf %173, %174 : vector<16x32xf32>
    %176 = vector.extract_strided_slice %146 {offsets = [0, 96], sizes = [16, 32], strides = [1, 1]} : vector<64x160xf32> to vector<16x32xf32>
    %177 = vector.extract_strided_slice %148 {offsets = [0, 96], sizes = [16, 32], strides = [1, 1]} : vector<16x160xf32> to vector<16x32xf32>
    %178 = arith.addf %176, %177 : vector<16x32xf32>
    %179 = vector.extract_strided_slice %146 {offsets = [16, 64], sizes = [16, 32], strides = [1, 1]} : vector<64x160xf32> to vector<16x32xf32>
    %180 = vector.extract_strided_slice %148 {offsets = [0, 64], sizes = [16, 32], strides = [1, 1]} : vector<16x160xf32> to vector<16x32xf32>
    %181 = arith.addf %179, %180 : vector<16x32xf32>
    %182 = arith.addf %178, %181 : vector<16x32xf32>
    %183 = vector.extract_strided_slice %146 {offsets = [32, 32], sizes = [16, 32], strides = [1, 1]} : vector<64x160xf32> to vector<16x32xf32>
    %184 = vector.extract_strided_slice %148 {offsets = [0, 32], sizes = [16, 32], strides = [1, 1]} : vector<16x160xf32> to vector<16x32xf32>
    %185 = arith.addf %183, %184 : vector<16x32xf32>
    %186 = arith.addf %182, %185 : vector<16x32xf32>
    %187 = vector.extract_strided_slice %146 {offsets = [48, 0], sizes = [16, 32], strides = [1, 1]} : vector<64x160xf32> to vector<16x32xf32>
    %188 = vector.extract_strided_slice %148 {offsets = [0, 0], sizes = [16, 32], strides = [1, 1]} : vector<16x160xf32> to vector<16x32xf32>
    %189 = arith.addf %187, %188 : vector<16x32xf32>
    %190 = arith.addf %186, %189 : vector<16x32xf32>
    %191 = vector.extract_strided_slice %146 {offsets = [48, 128], sizes = [16, 32], strides = [1, 1]} : vector<64x160xf32> to vector<16x32xf32>
    %192 = vector.extract_strided_slice %148 {offsets = [0, 128], sizes = [16, 32], strides = [1, 1]} : vector<16x160xf32> to vector<16x32xf32>
    %193 = arith.addf %191, %192 : vector<16x32xf32>
    %c1_i32_44 = arith.constant 1 : i32
    %194 = tpu.dynamic_rotate %193 by %c1_i32_44 dim 0 : vector<16x32xf32>, i32 -> vector<16x32xf32>
    %cst_45 = arith.constant 0.000000e+00 : f32
    %195 = vector.shape_cast %18 : vector<16x1xi1> to vector<16x1xi1>
    %196 = vector.broadcast %195 : vector<16x1xi1> to vector<16x32xi1>
    %197 = vector.broadcast %cst_45 : f32 to vector<16x32xf32>
    %198 = arith.select %196, %197, %194 : vector<16x32xi1>, vector<16x32xf32>
    %199 = arith.addf %190, %198 : vector<16x32xf32>
    %200 = vector.broadcast %149 : vector<1x32xf32> to vector<16x32xf32>
    %201 = arith.addf %199, %200 : vector<16x32xf32>
    %202 = vector.extract_strided_slice %146 {offsets = [0, 128], sizes = [16, 32], strides = [1, 1]} : vector<64x160xf32> to vector<16x32xf32>
    %203 = vector.extract_strided_slice %148 {offsets = [0, 128], sizes = [16, 32], strides = [1, 1]} : vector<16x160xf32> to vector<16x32xf32>
    %204 = arith.addf %202, %203 : vector<16x32xf32>
    %205 = vector.extract_strided_slice %146 {offsets = [16, 96], sizes = [16, 32], strides = [1, 1]} : vector<64x160xf32> to vector<16x32xf32>
    %206 = vector.extract_strided_slice %148 {offsets = [0, 96], sizes = [16, 32], strides = [1, 1]} : vector<16x160xf32> to vector<16x32xf32>
    %207 = arith.addf %205, %206 : vector<16x32xf32>
    %208 = arith.addf %204, %207 : vector<16x32xf32>
    %209 = vector.extract_strided_slice %146 {offsets = [32, 64], sizes = [16, 32], strides = [1, 1]} : vector<64x160xf32> to vector<16x32xf32>
    %210 = vector.extract_strided_slice %148 {offsets = [0, 64], sizes = [16, 32], strides = [1, 1]} : vector<16x160xf32> to vector<16x32xf32>
    %211 = arith.addf %209, %210 : vector<16x32xf32>
    %212 = arith.addf %208, %211 : vector<16x32xf32>
    %213 = vector.extract_strided_slice %146 {offsets = [48, 32], sizes = [16, 32], strides = [1, 1]} : vector<64x160xf32> to vector<16x32xf32>
    %214 = vector.extract_strided_slice %148 {offsets = [0, 32], sizes = [16, 32], strides = [1, 1]} : vector<16x160xf32> to vector<16x32xf32>
    %215 = arith.addf %213, %214 : vector<16x32xf32>
    %216 = arith.addf %212, %215 : vector<16x32xf32>
    %217 = vector.extract_strided_slice %146 {offsets = [0, 0], sizes = [16, 32], strides = [1, 1]} : vector<64x160xf32> to vector<16x32xf32>
    %218 = vector.extract_strided_slice %148 {offsets = [0, 0], sizes = [16, 32], strides = [1, 1]} : vector<16x160xf32> to vector<16x32xf32>
    %219 = arith.addf %217, %218 : vector<16x32xf32>
    %c15_i32_46 = arith.constant 15 : i32
    %220 = tpu.dynamic_rotate %219 by %c15_i32_46 dim 0 : vector<16x32xf32>, i32 -> vector<16x32xf32>
    %cst_47 = arith.constant 0.000000e+00 : f32
    %221 = vector.shape_cast %20 : vector<16x1xi1> to vector<16x1xi1>
    %222 = vector.broadcast %221 : vector<16x1xi1> to vector<16x32xi1>
    %223 = vector.broadcast %cst_47 : f32 to vector<16x32xf32>
    %224 = arith.select %222, %223, %220 : vector<16x32xi1>, vector<16x32xf32>
    %225 = arith.addf %216, %224 : vector<16x32xf32>
    %226 = vector.broadcast %149 : vector<1x32xf32> to vector<16x32xf32>
    %227 = arith.addf %225, %226 : vector<16x32xf32>
    %228 = vector.extract_strided_slice %146 {offsets = [16, 128], sizes = [16, 32], strides = [1, 1]} : vector<64x160xf32> to vector<16x32xf32>
    %229 = vector.extract_strided_slice %148 {offsets = [0, 128], sizes = [16, 32], strides = [1, 1]} : vector<16x160xf32> to vector<16x32xf32>
    %230 = arith.addf %228, %229 : vector<16x32xf32>
    %231 = vector.extract_strided_slice %146 {offsets = [32, 96], sizes = [16, 32], strides = [1, 1]} : vector<64x160xf32> to vector<16x32xf32>
    %232 = vector.extract_strided_slice %148 {offsets = [0, 96], sizes = [16, 32], strides = [1, 1]} : vector<16x160xf32> to vector<16x32xf32>
    %233 = arith.addf %231, %232 : vector<16x32xf32>
    %234 = arith.addf %230, %233 : vector<16x32xf32>
    %235 = vector.extract_strided_slice %146 {offsets = [48, 64], sizes = [16, 32], strides = [1, 1]} : vector<64x160xf32> to vector<16x32xf32>
    %236 = vector.extract_strided_slice %148 {offsets = [0, 64], sizes = [16, 32], strides = [1, 1]} : vector<16x160xf32> to vector<16x32xf32>
    %237 = arith.addf %235, %236 : vector<16x32xf32>
    %238 = arith.addf %234, %237 : vector<16x32xf32>
    %239 = vector.extract_strided_slice %146 {offsets = [0, 32], sizes = [16, 32], strides = [1, 1]} : vector<64x160xf32> to vector<16x32xf32>
    %240 = vector.extract_strided_slice %148 {offsets = [0, 32], sizes = [16, 32], strides = [1, 1]} : vector<16x160xf32> to vector<16x32xf32>
    %241 = arith.addf %239, %240 : vector<16x32xf32>
    %242 = vector.extract_strided_slice %146 {offsets = [16, 0], sizes = [16, 32], strides = [1, 1]} : vector<64x160xf32> to vector<16x32xf32>
    %243 = vector.extract_strided_slice %148 {offsets = [0, 0], sizes = [16, 32], strides = [1, 1]} : vector<16x160xf32> to vector<16x32xf32>
    %244 = arith.addf %242, %243 : vector<16x32xf32>
    %245 = arith.addf %241, %244 : vector<16x32xf32>
    %c15_i32_48 = arith.constant 15 : i32
    %246 = tpu.dynamic_rotate %245 by %c15_i32_48 dim 0 : vector<16x32xf32>, i32 -> vector<16x32xf32>
    %cst_49 = arith.constant 0.000000e+00 : f32
    %247 = vector.shape_cast %20 : vector<16x1xi1> to vector<16x1xi1>
    %248 = vector.broadcast %247 : vector<16x1xi1> to vector<16x32xi1>
    %249 = vector.broadcast %cst_49 : f32 to vector<16x32xf32>
    %250 = arith.select %248, %249, %246 : vector<16x32xi1>, vector<16x32xf32>
    %251 = arith.addf %238, %250 : vector<16x32xf32>
    %252 = vector.broadcast %149 : vector<1x32xf32> to vector<16x32xf32>
    %253 = arith.addf %251, %252 : vector<16x32xf32>
    %254 = tpu.concatenate %175, %201, %227, %253 in 1 : vector<16x32xf32>, vector<16x32xf32>, vector<16x32xf32>, vector<16x32xf32> -> vector<16x128xf32>
    %cst_50 = arith.constant -8.000000e+01 : f32
    %255 = vector.broadcast %cst_50 : f32 to vector<16x128xf32>
    %256 = arith.maximumf %254, %255 : vector<16x128xf32>
    %c0_51 = arith.constant 0 : index
    %c0_52 = arith.constant 0 : index
    %257 = vector.load %arg5[%c0_51, %c0_52] : memref<16x128xf32, #tpu.memory_space<vmem>>, vector<16x128xf32>
    tpu.vector_store %arg5[%c0_51, %c0_52], %256 {strides = array<i32>} : memref<16x128xf32, #tpu.memory_space<vmem>>, vector<16x128xf32>,
    return
  }
}

</mosaic_0001>

<bundles_post_ra>
// kernel: decoder_forward.1
= control target key start
LH: loop header
LB: loop body
LE: loop exit
PB: predicated region body
PF: predicated region fallthrough
CT: control target
= control target key end

     0   :  { %vm1665_vm0 = vcmask 1043456   ;;  %vm1664_vm1 = vcmask 64512   ;;  %v21_v3 = vlaneseq  ;;  %s1199_s22 = smov 80   ;;  %s1202_s23 = smov 112   ;;  %v1674_v27 = vmov 0  ;;  %s1656_s1 = inlined_call_operand.vmem [shape: bf16[8,64], index: 1, kind: input, shape index: {}]   ;;  %s1657_s0 = inlined_call_operand.vmem [shape: bf16[16,8], index: 0, kind: input, shape index: {}]   ;;  %s1658_s4 = inlined_call_operand.vmem [shape: f32[5,32], index: 4, kind: input, shape index: {}]   ;;  %s1659_s2 = inlined_call_operand.vmem [shape: bf16[12,128], index: 2, kind: input, shape index: {}]   ;;  %s1660_s3 = inlined_call_operand.vmem [shape: bf16[20,160], index: 3, kind: input, shape index: {}]   ;;  %s1661_s5 = inlined_call_operand.vmem [shape: f32[16,128], index: 5, kind: output, shape index: {}]  }
   0x1   :  { %v54_v0 = vld [vmem:[%s1656_s1] sm:$0xf]  ;;  %s1201_s1 = smov 16   ;;  %v1203_v36 = vmov 32.0   ;;  %vm142_vm8 = vcmask 261248   ;;  %s1204_s28 = smov 120  }
   0x2   :  { %v66_v1 = vsel %vm1665_vm0, %v54_v0, 0  ;;  %v1246_v2 = vld [vmem:[%s1657_s0] sm:$0xff]  ;;  %v1250_v5 = vshrl.u32 %v21_v3, 7  ;;  %s1200_s0 = smov 32   ;;  %1143 = vrcp.f32 %v1203_v36  ;;  %s1205_s29 = smov 124  }
   0x3   :  { %75 = vmatpush.bf16.msra.mxu2 %v66_v1  ;;  %v1140_v29 = vld [vmem:[%s1658_s4 + $0x1] ss:$0 sm:$0xff]  ;;  %v140_v33 = vld [vmem:[%s1658_s4] sm:$0x1]  ;;  %s1206_s10 = smov 64   ;;  %s1207_s11 = smov 96  }
   0x4   :  { %v28_v6 = vand.u32 7, %v1250_v5  ;;  %vm1663_vm2 = vcmp.lt.s32.totalorder %v1250_v5, 7  ;;  %v23_v11 = vadd.s32 8, %v1250_v5  ;;  %vm1662_vm5 = vcmp.lt.s32.totalorder %v1250_v5, 1  ;;  %v1141_v22 = vld [vmem:[%s1658_s4 + $0x4] ss:$0 sm:$0xff] }
   0x6   :  { %1093 = vmatmul.msk.bf16.vlgmr.msra.gmra.mxu2 %vm1664_vm1, %v1246_v2  ;;  %vm1254_vm3 = vcmp.eq.s32.totalorder %v28_v6, 7  ;;  %v35_v14 = vand.u32 7, %v23_v11  ;;  %vm1274_vm6 = vcmp.eq.s32.totalorder %v28_v6, 0 }
   0x8   :  { %vm1264_vm4 = vcmp.eq.s32.totalorder %v35_v14, 7  ;;  %vm1283_vm7 = vcmp.eq.s32.totalorder %v35_v14, 0  ;;  %v1144_v39 = vpop.eup %1143 }
   0x9   :  { %v1675_v27 = vsel %vm1283_vm7, 4294967295, %v1674_v27  ;;  %v157_v44 = vmul.f32 32.0, %v1144_v39  ;;  %vm161_vm9 = vweird.f32 %v1144_v39 }
   0xb   :  { %v158_v48 = vsub.f32 1.0, %v157_v44 }
   0xd   :  { %v159_v52 = vmul.f32 %v1144_v39, %v158_v48 }
   0xf   :  { %v160_v55 = vadd.f32 %v1144_v39, %v159_v52 }
  0x11   :  { %v162_v58 = vsel %vm161_vm9, %v1144_v39, %v160_v55 }
  0x89   :  { %v77_v4 = vpop.f32.mrf.mxu2 }
  0x8a   :  { %84 = vrot.lane.b32.xlu0 %v77_v4, %s1199_s22  ;;  %v111_v8 = vrot.slane %v77_v4, 1 }
  0x91   :  { %v79_v7 = vpop.f32.mrf.mxu2 }
  0x92   :  { %v112_v9 = vrot.slane %v79_v7, 1  ;;  %86 = vrot.lane.b32.xlu0 %v79_v7, %s1199_s22 }
  0x94   :  { %v114_v12 = vsel %vm1663_vm2, %v111_v8, %v112_v9  ;;  %v115_v16 = vsel %vm1663_vm2, %v112_v9, %v111_v8 }
  0x95   :  { %v120_v13 = vsel %vm1254_vm3, 0.0, %v114_v12  ;;  %v121_v17 = vsel %vm1264_vm4, 0.0, %v115_v16 }
  0x96   :  { %124 = vrot.lane.b32.xlu1 %v120_v13, %s1200_s0 }
  0x9e   :  { %126 = vrot.lane.b32.xlu1 %v121_v17, %s1200_s0 }
  0xfc   :  { %v85_v18 = vpop.permute.xlu0 %84 }
  0xfd   :  { %v90_v20 = vrot.slane %v85_v18, 7 }
 0x104   :  { %v87_v19 = vpop.permute.xlu0 %86 }
 0x105   :  { %v91_v21 = vrot.slane %v87_v19, 7 }
 0x107   :  { %v94_v23 = vsel %vm1662_vm5, %v91_v21, %v90_v20  ;;  %v93_v28 = vsel %vm1662_vm5, %v90_v20, %v91_v21 }
 0x108   :  { %v125_v24 = vpop.permute.xlu1 %124  ;;  %v99_v25 = vsel %vm1274_vm6, 0.0, %v94_v23  ;;  %v100_v31 = vsel %vm1283_vm7, 0.0, %v93_v28 }
 0x109   :  { %v130_v26 = vadd.f32 %v125_v24, %v77_v4  ;;  %103 = vrot.lane.b32.xlu2 %v99_v25, %s1201_s1 }
 0x10b   :  { %134 = vrot.lane.b32.xlu0 %v130_v26, %s1202_s23 }
 0x110   :  { %v127_v30 = vpop.permute.xlu1 %126 }
 0x111   :  { %v131_v32 = vadd.f32 %v127_v30, %v79_v7  ;;  %105 = vrot.lane.b32.xlu2 %v100_v31, %s1201_s1 }
 0x113   :  { %136 = vrot.lane.b32.xlu1 %v131_v32, %s1202_s23  ;;  %209 = vrot.lane.b32.xlu0 %v1140_v29, %s1201_s1 }
 0x119   :  { %198 = vrot.lane.b32.xlu2 %v140_v33, %s1201_s1 }
 0x163   :  { %v104_v34 = vpop.permute.xlu2 %103 }
 0x164   :  { %v109_v38 = vadd.f32 %v104_v34, %v77_v4 }
 0x166   :  { %v143_v42 = vsel %vm142_vm8, %v109_v38, 0.0 }
 0x16b   :  { %v106_v35 = vpop.permute.xlu2 %105 }
 0x16c   :  { %v110_v37 = vadd.f32 %v106_v35, %v79_v7 }
 0x16e   :  { %v144_v41 = vsel %vm142_vm8, %v110_v37, 0.0 }
 0x16f   :  { %v145_v45 = vadd.f32 %v144_v41, %v143_v42 }
 0x173   :  { %v199_v31 = vpop.permute.xlu2 %198 }
 0x17d   :  { %v135_v40 = vpop.permute.xlu0 %134 }
 0x17e   :  { %v146_v43 = vsel %vm142_vm8, %v135_v40, 0.0 }
 0x17f   :  { %v147_v46 = vadd.f32 %v146_v43, %v145_v45 }
 0x185   :  { %v137_v47 = vpop.permute.xlu1 %136  ;;  %v210_v36 = vpop.permute.xlu0 %209 }
 0x186   :  { %v148_v49 = vsel %vm142_vm8, %v137_v47, 0.0 }
 0x187   :  { %v149_v50 = vadd.f32 %v148_v49, %v147_v46 }
 0x189   :  { %v150_v51 = vrot.slane %v149_v50, 4 }
 0x18b   :  { %v151_v53 = vadd.f32 %v150_v51, %v149_v50 }
 0x18d   :  { %v152_v54 = vrot.slane %v151_v53, 2 }
 0x18f   :  { %v153_v56 = vadd.f32 %v152_v54, %v151_v53 }
 0x191   :  { %v154_v57 = vrot.slane %v153_v56, 1 }
 0x193   :  { %v155_v59 = vadd.f32 %v154_v57, %v153_v56 }
 0x195   :  { %v163_v60 = vmul.f32 %v162_v58, %v155_v59 }
 0x197   :  { %v164_v61 = vsub.f32 %v109_v38, %v163_v60  ;;  %v165_v62 = vsub.f32 %v110_v37, %v163_v60  ;;  %v166_v63 = vsub.f32 %v135_v40, %v163_v60  ;;  %v167_v0 = vsub.f32 %v137_v47, %v163_v60 }
 0x199   :  { %v168_v1 = vmul.f32 %v164_v61, %v164_v61  ;;  %v169_v3 = vmul.f32 %v165_v62, %v165_v62  ;;  %v170_v4 = vmul.f32 %v166_v63, %v166_v63  ;;  %v171_v6 = vmul.f32 %v167_v0, %v167_v0 }
 0x19b   :  { %v172_v7 = vsel %vm142_vm8, %v168_v1, 0.0  ;;  %v173_v8 = vsel %vm142_vm8, %v169_v3, 0.0  ;;  %v175_v11 = vsel %vm142_vm8, %v170_v4, 0.0  ;;  %v177_v13 = vsel %vm142_vm8, %v171_v6, 0.0 }
 0x19c   :  { %v174_v9 = vadd.f32 %v173_v8, %v172_v7 }
 0x19e   :  { %v176_v12 = vadd.f32 %v175_v11, %v174_v9 }
 0x1a0   :  { %v178_v14 = vadd.f32 %v177_v13, %v176_v12 }
 0x1a2   :  { %v179_v16 = vrot.slane %v178_v14, 4 }
 0x1a4   :  { %v180_v17 = vadd.f32 %v179_v16, %v178_v14 }
 0x1a6   :  { %v181_v18 = vrot.slane %v180_v17, 2 }
 0x1a8   :  { %v182_v19 = vadd.f32 %v181_v18, %v180_v17 }
 0x1aa   :  { %v183_v20 = vrot.slane %v182_v19, 1 }
 0x1ac   :  { %v184_v21 = vadd.f32 %v183_v20, %v182_v19 }
 0x1ae   :  { %v185_v23 = vmul.f32 %v184_v21, %v162_v58 }
 0x1b0   :  { %v186_v24 = vadd.f32 1e-05, %v185_v23 }
 0x1b2   :  { %1145 = vrsqrt.f32 %v186_v24  ;;  %vm193_vm11 = vweird.f32 %v186_v24 }
 0x1b8   :  { %v1146_v25 = vpop.eup %1145 }
 0x1b9   :  { %v188_v26 = vmul.f32 %v1146_v25, %v186_v24  ;;  %vm194_vm10 = vweird.f32 %v1146_v25 }
 0x1ba   :  { %vm195_vm12 = vmor %vm193_vm11, %vm194_vm10 }
 0x1bb   :  { %v189_v28 = vmul.f32 %v1146_v25, %v188_v26 }
 0x1bd   :  { %v190_v29 = vmul.f32 0.5, %v189_v28 }
 0x1bf   :  { %v191_v30 = vsub.f32 1.5, %v190_v29 }
 0x1c1   :  { %v192_v32 = vmul.f32 %v1146_v25, %v191_v30 }
 0x1c3   :  { %v196_v33 = vsel %vm195_vm12, %v1146_v25, %v192_v32 }
 0x1c4   :  { %v201_v34 = vmul.f32 %v199_v31, %v196_v33 }
 0x1c6   :  { %v202_v35 = vperm.slane %v201_v34, 0 }
 0x1c8   :  { %v203_v37 = vmul.f32 %v202_v35, %v164_v61  ;;  %v204_v38 = vmul.f32 %v202_v35, %v165_v62  ;;  %v205_v39 = vmul.f32 %v202_v35, %v166_v63  ;;  %v206_v40 = vmul.f32 %v202_v35, %v167_v0 }
 0x1ca   :  { %v1306_v41 = vadd.f32 %v210_v36, %v203_v37  ;;  %v1308_v42 = vadd.f32 %v210_v36, %v204_v38  ;;  %v1310_v43 = vadd.f32 %v210_v36, %v205_v39  ;;  %v1312_v44 = vadd.f32 %v210_v36, %v206_v40  ;;  %v349_v39 = vld [vmem:[%s1659_s2 + $0x4] sm:$0x3]  ;;  %v312_v40 = vld [vmem:[%s1659_s2] sm:$0xf] }
 0x1cc   :  { %v1094_v45 = vmul.f32 -1.442695, %v1306_v41  ;;  %v1095_v46 = vmul.f32 -1.442695, %v1308_v42  ;;  %v1096_v47 = vmul.f32 -1.442695, %v1310_v43 }
 0x1cd   :  { %v1097_v48 = vmul.f32 -1.442695, %v1312_v44 }
 0x1ce   :  { %1147 = vpow2.f32 %v1094_v45 }
 0x1cf   :  { %1149 = vpow2.f32 %v1095_v46 }
 0x1d0   :  { %1151 = vpow2.f32 %v1096_v47 }
 0x1d1   :  { %1153 = vpow2.f32 %v1097_v48 }
 0x1d4   :  { %v1148_v49 = vpop.eup %1147 }
 0x1d5   :  { %v1150_v50 = vpop.eup %1149  ;;  %v228_v51 = vadd.f32 1.0, %v1148_v49 }
 0x1d6   :  { %v1152_v52 = vpop.eup %1151  ;;  %v229_v53 = vadd.f32 1.0, %v1150_v50 }
 0x1d7   :  { %v1154_v54 = vpop.eup %1153  ;;  %v230_v55 = vadd.f32 1.0, %v1152_v52  ;;  %1155 = vrcp.f32 %v228_v51  ;;  %vm237_vm13 = vweird.f32 %v228_v51  ;;  %v241_v62 = vand.u32 2147483647, %v228_v51 }
 0x1d8   :  { %v231_v56 = vadd.f32 1.0, %v1154_v54  ;;  %1157 = vrcp.f32 %v229_v53  ;;  %vm252_vm14 = vweird.f32 %v229_v53  ;;  %v256_v1 = vand.u32 2147483647, %v229_v53 }
 0x1d9   :  { %1159 = vrcp.f32 %v230_v55  ;;  %v271_v4 = vand.u32 2147483647, %v230_v55  ;;  %v243_v7 = vand.u32 2147483648, %v228_v51  ;;  %v258_v11 = vand.u32 2147483648, %v229_v53 }
 0x1da   :  { %1161 = vrcp.f32 %v231_v56  ;;  %v273_v13 = vand.u32 2147483648, %v230_v55  ;;  %vm267_vm9 = vweird.f32 %v230_v55  ;;  %vm257_vm11 = vcmp.eq.f32.partialorder %v256_v1, 8.507059e+37 }
 0x1db   :  { %v244_v20 = vor.u32 1.1754944e-38, %v243_v7  ;;  %v259_v24 = vor.u32 1.1754944e-38, %v258_v11  ;;  %vm242_vm2 = vcmp.eq.f32.partialorder %v241_v62, 8.507059e+37  ;;  %vm272_vm0 = vcmp.eq.f32.partialorder %v271_v4, 8.507059e+37 }
 0x1dc   :  { %v274_v26 = vor.u32 1.1754944e-38, %v273_v13  ;;  %v288_v34 = vand.u32 2147483648, %v231_v56  ;;  %v286_v35 = vand.u32 2147483647, %v231_v56 }
 0x1dd   :  { %v1156_v57 = vpop.eup %1155 }
 0x1de   :  { %v1158_v58 = vpop.eup %1157  ;;  %v233_v59 = vmul.f32 %v1156_v57, %v228_v51  ;;  %vm238_vm15 = vweird.f32 %v1156_v57  ;;  %v289_v37 = vor.u32 1.1754944e-38, %v288_v34 }
 0x1df   :  { %v1160_v60 = vpop.eup %1159  ;;  %v248_v61 = vmul.f32 %v1158_v58, %v229_v53  ;;  %vm253_vm8 = vweird.f32 %v1158_v58  ;;  %vm239_vm12 = vmor %vm237_vm13, %vm238_vm15  ;;  %vm282_vm13 = vweird.f32 %v231_v56  ;;  %vm287_vm15 = vcmp.eq.f32.partialorder %v286_v35, 8.507059e+37 }
 0x1e0   :  { %v1162_v63 = vpop.eup %1161  ;;  %v263_v0 = vmul.f32 %v1160_v60, %v230_v55  ;;  %v234_v3 = vsub.f32 1.0, %v233_v59  ;;  %vm268_vm10 = vweird.f32 %v1160_v60  ;;  %vm254_vm5 = vmor %vm252_vm14, %vm253_vm8  ;;  %vm1679_vm8 = vcmp.lt.s32.totalorder %v1250_v5, 7 }
 0x1e1   :  { %v249_v6 = vsub.f32 1.0, %v248_v61  ;;  %v278_v8 = vmul.f32 %v1162_v63, %v231_v56  ;;  %vm269_vm1 = vmor %vm267_vm9, %vm268_vm10  ;;  %vm283_vm7 = vweird.f32 %v1162_v63  ;;  %vm1681_vm10 = vcmp.lt.s32.totalorder %v1250_v5, 1 }
 0x1e2   :  { %v264_v9 = vsub.f32 1.0, %v263_v0  ;;  %v235_v12 = vmul.f32 %v1156_v57, %v234_v3  ;;  %vm284_vm14 = vmor %vm282_vm13, %vm283_vm7  ;;  %vm454_vm13 = vcmask 523520  }
 0x1e3   :  { %v250_v14 = vmul.f32 %v1158_v58, %v249_v6  ;;  %v279_v16 = vsub.f32 1.0, %v278_v8  ;;  %vm1680_vm9 = vmmov %vm1679_vm8 }
 0x1e4   :  { %v265_v17 = vmul.f32 %v1160_v60, %v264_v9  ;;  %v236_v18 = vadd.f32 %v1156_v57, %v235_v12 }
 0x1e5   :  { %v251_v19 = vadd.f32 %v1158_v58, %v250_v14  ;;  %v280_v21 = vmul.f32 %v1162_v63, %v279_v16 }
 0x1e6   :  { %v266_v23 = vadd.f32 %v1160_v60, %v265_v17  ;;  %v240_v25 = vsel %vm239_vm12, %v1156_v57, %v236_v18  ;;  %vm1683_vm12 = vnez %v1675_v27 }
 0x1e7   :  { %v255_v28 = vsel %vm254_vm5, %v1158_v58, %v251_v19  ;;  %v245_v29 = vsel %vm242_vm2, %v244_v20, %v240_v25  ;;  %v281_v32 = vadd.f32 %v1162_v63, %v280_v21  ;;  %vm352_vm2 = vcmask 31744  }
 0x1e8   :  { %v270_v30 = vsel %vm269_vm1, %v1160_v60, %v266_v23  ;;  %v260_v31 = vsel %vm257_vm11, %v259_v24, %v255_v28  ;;  %296 = vrot.lane.b32.xlu1 %v245_v29, %s1204_s28  ;;  %vm356_vm1 = vcmask 1041408   ;;  %vm1677_vm5 = vcmask 64512   ;;  %vm1682_vm11 = vmmov %vm1681_vm10 }
 0x1e9   :  { %v275_v33 = vsel %vm272_vm0, %v274_v26, %v270_v30  ;;  %298 = vrot.lane.b32.xlu2 %v260_v31, %s1204_s28  ;;  %v285_v36 = vsel %vm284_vm14, %v1162_v63, %v281_v32  ;;  %v358_v45 = vsel %vm356_vm1, %v349_v39, 0  ;;  %vm1676_vm0 = vcmask 1043456   ;;  %vm1678_vm7 = vmmov %vm1677_vm5  ;;  %v452_v30 = vld [vmem:[%s1658_s4 + $0x2] sm:$0x1] }
 0x1ea   :  { %300 = vrot.lane.b32.xlu0 %v275_v33, %s1204_s28  ;;  %v290_v38 = vsel %vm287_vm15, %v289_v37, %v285_v36  ;;  %v328_v46 = vsel %vm1676_vm0, %v312_v40, 0  ;;  %367 = vmatpush.bf16.msrb.mxu2 %v358_v45  ;;  %v1142_v37 = vld [vmem:[%s1658_s4 + $0x3] ss:$0 sm:$0xff] }
 0x1eb   :  { %337 = vmatpush.bf16.msra.mxu1 %v328_v46 }
 0x1f0   :  { %302 = vrot.lane.b32.xlu1 %v290_v38, %s1204_s28 }
 0x1f2   :  { %350 = vrot.lane.b32.xlu0 %v1246_v2, %s1205_s29 }
 0x243   :  { %v299_v47 = vpop.permute.xlu2 %298 }
 0x244   :  { %v309_v49 = vmul.f32 %v299_v47, %v1308_v42 }
 0x25a   :  { %v297_v48 = vpop.permute.xlu1 %296 }
 0x25b   :  { %v308_v2 = vmul.f32 %v297_v48, %v1306_v41  ;;  %v851_v41 = vld [vmem:[%s1660_s3 + $0x10] sm:$0x33] }
 0x25c   :  { %v301_v50 = vpop.permute.xlu0 %300  ;;  %v853_v42 = vunpack.c.l.b16 %v851_v41 }
 0x25d   :  { %v313_v51 = vpack.c.bf16 %v309_v49, %v308_v2  ;;  %v310_v53 = vmul.f32 %v301_v50, %v1310_v43  ;;  %v1208_v50 = vmov 64.0  }
 0x25e   :  { %v855_v57 = vpack.c.b16 %v853_v42, %v853_v42  ;;  %1163 = vrcp.f32 %v1208_v50 }
 0x25f   :  { %317 = vrot.lane.b32.xlu2 %v313_v51, %s1202_s23 }
 0x260   :  { %v858_v58 = vsel %vm356_vm1, %v855_v57, 0 }
 0x261   :  { %870 = vmatpush.bf16.msra.mxu2 %v858_v58 }
 0x262   :  { %v303_v52 = vpop.permute.xlu1 %302 }
 0x263   :  { %v311_v54 = vmul.f32 %v303_v52, %v1312_v44  ;;  %v854_v44 = vunpack.c.h.b16 %v851_v41 }
 0x264   :  { %v351_v55 = vpop.permute.xlu0 %350  ;;  %v1164_v42 = vpop.eup %1163 }
 0x265   :  { %v314_v56 = vpack.c.bf16 %v311_v54, %v310_v53  ;;  %1100 = vmatmul.msk.bf16.vlgmr.msrb.gmra.mxu2 %vm352_vm2, %v351_v55  ;;  %v856_v59 = vpack.c.b16 %v854_v44, %v854_v44  ;;  %vm481_vm14 = vweird.f32 %v1164_v42 }
 0x267   :  { %319 = vrot.lane.b32.xlu1 %v314_v56, %s1202_s23  ;;  %v861_v60 = vsel %vm356_vm1, %v856_v59, 0 }
 0x268   :  { %884 = vmatpush.bf16.msrb.mxu1 %v861_v60  ;;  %v477_v60 = vmul.f32 64.0, %v1164_v42 }
 0x275   :  { %1125 = vmatmul.msk.bf16.vlgmr.msra.gmra.mxu2 %vm352_vm2, %v351_v55 }
 0x2b9   :  { %v318_v43 = vpop.permute.xlu2 %317 }
 0x2ba   :  { %1098 = vmatmul.msk.bf16.vlgmr.msra.gmra.mxu1 %vm1677_vm5, %v318_v43 }
 0x2d9   :  { %v320_v61 = vpop.permute.xlu1 %319 }
 0x2da   :  { %1099 = vmatmul.msk.bf16.gmra.mxu1 %vm1678_vm7, %v320_v61 }
 0x2e8   :  { %v369_v63 = vpop.f32.mrf.mxu2 }
 0x2ea   :  { %1126 = vmatmul.msk.bf16.vlgmr.msrb.gmra.mxu1 %vm352_vm2, %v351_v55 }
 0x2f0   :  { %v371_v1 = vpop.f32.mrf.mxu2 }
 0x337   :  { %v339_v62 = vpop.f32.mrf.mxu1 }
 0x338   :  { %v374_v6 = vadd.f32 %v369_v63, %v339_v62 }
 0x33a   :  { %v420_v9 = vrot.slane %v374_v6, 1 }
 0x33f   :  { %v341_v0 = vpop.f32.mrf.mxu1 }
 0x340   :  { %v375_v3 = vadd.f32 %v371_v1, %v341_v0 }
 0x342   :  { %v421_v8 = vrot.slane %v375_v3, 1 }
 0x344   :  { %v423_v11 = vsel %vm1679_vm8, %v421_v8, %v420_v9  ;;  %v422_v16 = vsel %vm1680_vm9, %v420_v9, %v421_v8 }
 0x345   :  { %v425_v14 = vsel %vm1264_vm4, 0.0, %v423_v11  ;;  %v424_v17 = vsel %vm1254_vm3, 0.0, %v422_v16 }
 0x357   :  { %v344_v4 = vpop.f32.mrf.mxu1 }
 0x358   :  { %v376_v7 = vadd.f32 %v369_v63, %v344_v4 }
 0x35a   :  { %402 = vrot.lane.b32.xlu1 %v376_v7, %s1206_s10  ;;  %380 = vrot.lane.b32.xlu2 %v376_v7, %s1200_s0 }
 0x35f   :  { %v346_v12 = vpop.f32.mrf.mxu1 }
 0x360   :  { %v377_v13 = vadd.f32 %v371_v1, %v346_v12  ;;  %v478_v1 = vsub.f32 1.0, %v477_v60 }
 0x362   :  { %430 = vrot.lane.b32.xlu1 %v425_v14, %s1206_s10  ;;  %404 = vrot.lane.b32.xlu2 %v377_v13, %s1206_s10 }
 0x363   :  { %382 = vrot.lane.b32.xlu0 %v377_v13, %s1200_s0 }
 0x36b   :  { %428 = vrot.lane.b32.xlu0 %v424_v17, %s1206_s10 }
 0x3b4   :  { %v381_v20 = vpop.permute.xlu2 %380 }
 0x3b5   :  { %v386_v23 = vrot.slane %v381_v20, 7 }
 0x3bc   :  { %v405_v31 = vpop.permute.xlu2 %404 }
 0x3bd   :  { %v409_v32 = vadd.f32 %v405_v31, %v375_v3 }
 0x3cc   :  { %v403_v18 = vpop.permute.xlu1 %402 }
 0x3cd   :  { %v408_v19 = vadd.f32 %v403_v18, %v374_v6 }
 0x3cf   :  { %438 = vrot.lane.b32.xlu1 %v408_v19, %s1207_s11 }
 0x3d4   :  { %v431_v33 = vpop.permute.xlu1 %430 }
 0x3d5   :  { %v383_v21 = vpop.permute.xlu0 %382  ;;  %v435_v35 = vadd.f32 %v431_v33, %v377_v13 }
 0x3d6   :  { %v387_v24 = vrot.slane %v383_v21, 7 }
 0x3d7   :  { %414 = vrot.lane.b32.xlu1 %v375_v3, %s1206_s10 }
 0x3d8   :  { %v389_v25 = vsel %vm1681_vm10, %v387_v24, %v386_v23  ;;  %v388_v26 = vsel %vm1682_vm11, %v386_v23, %v387_v24 }
 0x3d9   :  { %v390_v28 = vsel %vm1274_vm6, 0.0, %v389_v25  ;;  %v391_v29 = vsel %vm1683_vm12, 0.0, %v388_v26 }
 0x3da   :  { %394 = vrot.lane.b32.xlu2 %v390_v28, %s1200_s0  ;;  %396 = vrot.lane.b32.xlu0 %v391_v29, %s1200_s0 }
 0x3dd   :  { %v429_v34 = vpop.permute.xlu0 %428 }
 0x3de   :  { %v434_v36 = vadd.f32 %v429_v34, %v376_v7 }
 0x3df   :  { %534 = vrot.lane.b32.xlu1 %v452_v30, %s1200_s0 }
 0x3e2   :  { %412 = vrot.lane.b32.xlu2 %v374_v6, %s1206_s10  ;;  %440 = vrot.lane.b32.xlu0 %v409_v32, %s1207_s11 }
 0x3ea   :  { %446 = vrot.lane.b32.xlu2 %v434_v36, %s1207_s11  ;;  %448 = vrot.lane.b32.xlu0 %v435_v35, %s1207_s11 }
 0x3f2   :  { %549 = vrot.lane.b32.xlu2 %v1142_v37, %s1200_s0 }
 0x434   :  { %v395_v38 = vpop.permute.xlu2 %394 }
 0x435   :  { %v400_v40 = vadd.f32 %v395_v38, %v374_v6 }
 0x437   :  { %v455_v48 = vsel %vm454_vm13, %v400_v40, 0.0 }
 0x43c   :  { %v413_v47 = vpop.permute.xlu2 %412 }
 0x43d   :  { %v418_v52 = vadd.f32 %v413_v47, %v376_v7  ;;  %v479_v7 = vmul.f32 %v1164_v42, %v478_v1 }
 0x43f   :  { %v462_v58 = vsel %vm454_vm13, %v418_v52, 0.0  ;;  %v480_v11 = vadd.f32 %v1164_v42, %v479_v7 }
 0x441   :  { %v439_v39 = vpop.permute.xlu1 %438  ;;  %v482_v14 = vsel %vm481_vm14, %v1164_v42, %v480_v11 }
 0x442   :  { %v458_v53 = vsel %vm454_vm13, %v439_v39, 0.0 }
 0x444   :  { %v447_v43 = vpop.permute.xlu2 %446 }
 0x445   :  { %v466_v62 = vsel %vm454_vm13, %v447_v43, 0.0 }
 0x449   :  { %v415_v51 = vpop.permute.xlu1 %414 }
 0x44a   :  { %v419_v56 = vadd.f32 %v415_v51, %v377_v13 }
 0x44c   :  { %v397_v45 = vpop.permute.xlu0 %396  ;;  %v464_v59 = vsel %vm454_vm13, %v419_v56, 0.0 }
 0x44d   :  { %v401_v46 = vadd.f32 %v397_v45, %v375_v3 }
 0x44f   :  { %v456_v49 = vsel %vm454_vm13, %v401_v46, 0.0 }
 0x450   :  { %v457_v2 = vadd.f32 %v456_v49, %v455_v48 }
 0x452   :  { %v459_v54 = vadd.f32 %v458_v53, %v457_v2 }
 0x454   :  { %v441_v55 = vpop.permute.xlu0 %440 }
 0x455   :  { %v460_v41 = vsel %vm454_vm13, %v441_v55, 0.0 }
 0x456   :  { %v461_v57 = vadd.f32 %v460_v41, %v459_v54 }
 0x458   :  { %v463_v44 = vadd.f32 %v462_v58, %v461_v57 }
 0x45a   :  { %v465_v61 = vadd.f32 %v464_v59, %v463_v44 }
 0x45c   :  { %v449_v63 = vpop.permute.xlu0 %448  ;;  %v467_v0 = vadd.f32 %v466_v62, %v465_v61 }
 0x45d   :  { %v468_v3 = vsel %vm454_vm13, %v449_v63, 0.0 }
 0x45e   :  { %v469_v4 = vadd.f32 %v468_v3, %v467_v0 }
 0x460   :  { %v470_v6 = vrot.slane %v469_v4, 4 }
 0x462   :  { %v471_v8 = vadd.f32 %v470_v6, %v469_v4  ;;  %v550_v6 = vpop.permute.xlu2 %549 }
 0x464   :  { %v472_v9 = vrot.slane %v471_v8, 2 }
 0x466   :  { %v473_v12 = vadd.f32 %v472_v9, %v471_v8 }
 0x468   :  { %v474_v13 = vrot.slane %v473_v12, 1 }
 0x46a   :  { %v475_v16 = vadd.f32 %v474_v13, %v473_v12 }
 0x46c   :  { %v483_v17 = vmul.f32 %v482_v14, %v475_v16 }
 0x46e   :  { %v484_v18 = vsub.f32 %v400_v40, %v483_v17  ;;  %v485_v19 = vsub.f32 %v401_v46, %v483_v17  ;;  %v486_v20 = vsub.f32 %v439_v39, %v483_v17  ;;  %v487_v21 = vsub.f32 %v441_v55, %v483_v17 }
 0x46f   :  { %v488_v23 = vsub.f32 %v418_v52, %v483_v17  ;;  %v489_v28 = vsub.f32 %v419_v56, %v483_v17  ;;  %v490_v33 = vsub.f32 %v447_v43, %v483_v17  ;;  %v491_v37 = vsub.f32 %v449_v63, %v483_v17  ;;  %v535_v63 = vpop.permute.xlu1 %534 }
 0x470   :  { %v492_v24 = vmul.f32 %v484_v18, %v484_v18  ;;  %v493_v25 = vmul.f32 %v485_v19, %v485_v19  ;;  %v494_v26 = vmul.f32 %v486_v20, %v486_v20  ;;  %v495_v29 = vmul.f32 %v487_v21, %v487_v21 }
 0x471   :  { %v496_v34 = vmul.f32 %v488_v23, %v488_v23  ;;  %v497_v38 = vmul.f32 %v489_v28, %v489_v28  ;;  %v498_v45 = vmul.f32 %v490_v33, %v490_v33  ;;  %v499_v48 = vmul.f32 %v491_v37, %v491_v37 }
 0x472   :  { %v500_v30 = vsel %vm454_vm13, %v492_v24, 0.0  ;;  %v501_v31 = vsel %vm454_vm13, %v493_v25, 0.0  ;;  %v503_v35 = vsel %vm454_vm13, %v494_v26, 0.0  ;;  %v505_v39 = vsel %vm454_vm13, %v495_v29, 0.0 }
 0x473   :  { %v502_v32 = vadd.f32 %v501_v31, %v500_v30  ;;  %v507_v46 = vsel %vm454_vm13, %v496_v34, 0.0  ;;  %v509_v49 = vsel %vm454_vm13, %v497_v38, 0.0  ;;  %v511_v50 = vsel %vm454_vm13, %v498_v45, 0.0 }
 0x474   :  { %v513_v52 = vsel %vm454_vm13, %v499_v48, 0.0 }
 0x475   :  { %v504_v36 = vadd.f32 %v503_v35, %v502_v32 }
 0x477   :  { %v506_v40 = vadd.f32 %v505_v39, %v504_v36 }
 0x479   :  { %v508_v47 = vadd.f32 %v507_v46, %v506_v40 }
 0x47b   :  { %v510_v2 = vadd.f32 %v509_v49, %v508_v47 }
 0x47d   :  { %v512_v51 = vadd.f32 %v511_v50, %v510_v2 }
 0x47f   :  { %v514_v53 = vadd.f32 %v513_v52, %v512_v51 }
 0x481   :  { %v515_v54 = vrot.slane %v514_v53, 4 }
 0x483   :  { %v516_v55 = vadd.f32 %v515_v54, %v514_v53 }
 0x485   :  { %v517_v56 = vrot.slane %v516_v55, 2 }
 0x487   :  { %v518_v41 = vadd.f32 %v517_v56, %v516_v55 }
 0x489   :  { %v519_v42 = vrot.slane %v518_v41, 1 }
 0x48b   :  { %v520_v57 = vadd.f32 %v519_v42, %v518_v41 }
 0x48d   :  { %v521_v58 = vmul.f32 %v520_v57, %v482_v14 }
 0x48f   :  { %v522_v43 = vadd.f32 1e-05, %v521_v58 }
 0x491   :  { %1165 = vrsqrt.f32 %v522_v43  ;;  %vm529_vm1 = vweird.f32 %v522_v43 }
 0x497   :  { %v1166_v44 = vpop.eup %1165 }
 0x498   :  { %v524_v59 = vmul.f32 %v1166_v44, %v522_v43  ;;  %vm530_vm15 = vweird.f32 %v1166_v44 }
 0x499   :  { %vm531_vm0 = vmor %vm529_vm1, %vm530_vm15 }
 0x49a   :  { %v525_v60 = vmul.f32 %v1166_v44, %v524_v59 }
 0x49c   :  { %v526_v61 = vmul.f32 0.5, %v525_v60 }
 0x49e   :  { %v527_v62 = vsub.f32 1.5, %v526_v61 }
 0x4a0   :  { %v528_v0 = vmul.f32 %v1166_v44, %v527_v62 }
 0x4a2   :  { %v532_v1 = vsel %vm531_vm0, %v1166_v44, %v528_v0 }
 0x4a3   :  { %v537_v3 = vmul.f32 %v535_v63, %v532_v1 }
 0x4a5   :  { %v538_v4 = vperm.slane %v537_v3, 0 }
 0x4a7   :  { %v539_v7 = vmul.f32 %v538_v4, %v484_v18  ;;  %v540_v8 = vmul.f32 %v538_v4, %v485_v19  ;;  %v541_v9 = vmul.f32 %v538_v4, %v486_v20  ;;  %v542_v11 = vmul.f32 %v538_v4, %v487_v21 }
 0x4a8   :  { %v543_v12 = vmul.f32 %v538_v4, %v488_v23  ;;  %v544_v13 = vmul.f32 %v538_v4, %v489_v28  ;;  %v546_v20 = vmul.f32 %v538_v4, %v491_v37  ;;  %v545_v23 = vmul.f32 %v538_v4, %v490_v33 }
 0x4a9   :  { %v1399_v14 = vadd.f32 %v550_v6, %v539_v7  ;;  %v1401_v16 = vadd.f32 %v550_v6, %v540_v8  ;;  %v1403_v17 = vadd.f32 %v550_v6, %v541_v9  ;;  %v1405_v24 = vadd.f32 %v550_v6, %v542_v11 }
 0x4aa   :  { %v1407_v25 = vadd.f32 %v550_v6, %v543_v12  ;;  %v1409_v26 = vadd.f32 %v550_v6, %v544_v13  ;;  %v1417_v31 = vadd.f32 %v550_v6, %v546_v20  ;;  %v1419_v32 = vadd.f32 %v550_v6, %v545_v23 }
 0x4ab   :  { %v1103_v29 = vmul.f32 -1.442695, %v1403_v17  ;;  %v1102_v18 = vmul.f32 -1.442695, %v1401_v16  ;;  %v1101_v19 = vmul.f32 -1.442695, %v1399_v14 }
 0x4ac   :  { %v1106_v21 = vmul.f32 -1.442695, %v1409_v26  ;;  %v1105_v28 = vmul.f32 -1.442695, %v1407_v25  ;;  %v1104_v30 = vmul.f32 -1.442695, %v1405_v24 }
 0x4ad   :  { %1167 = vpow2.f32 %v1103_v29  ;;  %v1108_v37 = vmul.f32 -1.442695, %v1417_v31  ;;  %v1107_v39 = vmul.f32 -1.442695, %v1419_v32 }
 0x4ae   :  { %1169 = vpow2.f32 %v1102_v18 }
 0x4af   :  { %1171 = vpow2.f32 %v1101_v19 }
 0x4b0   :  { %1173 = vpow2.f32 %v1106_v21 }
 0x4b1   :  { %1175 = vpow2.f32 %v1105_v28 }
 0x4b2   :  { %1177 = vpow2.f32 %v1104_v30 }
 0x4b3   :  { %v1168_v34 = vpop.eup %1167 }
 0x4b4   :  { %v1170_v35 = vpop.eup %1169  ;;  %v586_v36 = vadd.f32 1.0, %v1168_v34 }
 0x4b5   :  { %v1172_v33 = vpop.eup %1171  ;;  %v1422_v38 = vadd.f32 1.0, %v1170_v35 }
 0x4b6   :  { %v1174_v40 = vpop.eup %1173  ;;  %1179 = vrcp.f32 %v586_v36  ;;  %v1426_v47 = vadd.f32 1.0, %v1172_v33  ;;  %v631_v2 = vand.u32 2147483647, %v586_v36  ;;  %v633_v50 = vand.u32 2147483648, %v586_v36 }
 0x4b7   :  { %v1176_v45 = vpop.eup %1175  ;;  %1181 = vrcp.f32 %v1422_v38  ;;  %v1428_v48 = vadd.f32 1.0, %v1174_v40  ;;  %v616_v51 = vand.u32 2147483647, %v1422_v38  ;;  %v618_v54 = vand.u32 2147483648, %v1422_v38 }
 0x4b8   :  { %v1178_v46 = vpop.eup %1177  ;;  %1183 = vpow2.f32 %v1108_v37  ;;  %v1430_v49 = vadd.f32 1.0, %v1176_v45  ;;  %vm627_vm2 = vweird.f32 %v586_v36  ;;  %vm612_vm5 = vweird.f32 %v1422_v38 }
 0x4b9   :  { %1185 = vpow2.f32 %v1107_v39  ;;  %v1435_v52 = vadd.f32 1.0, %v1178_v46  ;;  %vm1440_vm7 = vcmp.eq.f32.partialorder %v631_v2, 8.507059e+37  ;;  %v634_v57 = vor.u32 1.1754944e-38, %v633_v50 }
 0x4ba   :  { %1187 = vrcp.f32 %v1426_v47  ;;  %v601_v43 = vand.u32 2147483647, %v1426_v47  ;;  %vm1446_vm8 = vcmp.eq.f32.partialorder %v616_v51, 8.507059e+37  ;;  %v603_v61 = vand.u32 2147483648, %v1426_v47 }
 0x4bb   :  { %1189 = vrcp.f32 %v1428_v48  ;;  %v619_v0 = vor.u32 1.1754944e-38, %v618_v54  ;;  %vm597_vm9 = vweird.f32 %v1426_v47  ;;  %v676_v1 = vand.u32 2147483647, %v1428_v48 }
 0x4bc   :  { %v1180_v53 = vpop.eup %1179  ;;  %1191 = vrcp.f32 %v1430_v49  ;;  %vm672_vm11 = vweird.f32 %v1428_v48  ;;  %v678_v7 = vand.u32 2147483648, %v1428_v48  ;;  %vm1461_vm14 = vcmp.eq.f32.partialorder %v601_v43, 8.507059e+37 }
 0x4bd   :  { %v1182_v55 = vpop.eup %1181  ;;  %v623_v56 = vmul.f32 %v1180_v53, %v586_v36  ;;  %1193 = vrcp.f32 %v1435_v52  ;;  %vm628_vm10 = vweird.f32 %v1180_v53  ;;  %v604_v18 = vor.u32 1.1754944e-38, %v603_v61 }
 0x4be   :  { %v1184_v41 = vpop.eup %1183  ;;  %v608_v58 = vmul.f32 %v1182_v55, %v1422_v38  ;;  %vm613_vm13 = vweird.f32 %v1182_v55  ;;  %vm629_vm15 = vmor %vm627_vm2, %vm628_vm10  ;;  %v663_v54 = vand.u32 2147483648, %v1430_v49  ;;  %v648_v43 = vand.u32 2147483648, %v1435_v52 }
 0x4bf   :  { %v1186_v44 = vpop.eup %1185  ;;  %v624_v59 = vsub.f32 1.0, %v623_v56  ;;  %v1470_v23 = vadd.f32 1.0, %v1184_v41  ;;  %vm614_vm0 = vmor %vm612_vm5, %vm613_vm13  ;;  %v661_v56 = vand.u32 2147483647, %v1430_v49 }
 0x4c0   :  { %v1188_v62 = vpop.eup %1187  ;;  %v609_v63 = vsub.f32 1.0, %v608_v58  ;;  %v1474_v37 = vadd.f32 1.0, %v1186_v44  ;;  %v664_v44 = vor.u32 1.1754944e-38, %v663_v54 }
 0x4c1   :  { %v1454_v3 = vpop.eup %1189  ;;  %v625_v4 = vmul.f32 %v1180_v53, %v624_v59  ;;  %v593_v6 = vmul.f32 %v1188_v62, %v1426_v47  ;;  %vm598_vm1 = vweird.f32 %v1188_v62  ;;  %1195 = vrcp.f32 %v1470_v23 }
 0x4c2   :  { %v1459_v8 = vpop.eup %1191  ;;  %v610_v9 = vmul.f32 %v1182_v55, %v609_v63  ;;  %v668_v12 = vmul.f32 %v1454_v3, %v1428_v48  ;;  %vm673_vm2 = vweird.f32 %v1454_v3  ;;  %vm599_vm5 = vmor %vm597_vm9, %vm598_vm1  ;;  %1197 = vrcp.f32 %v1474_v37 }
 0x4c3   :  { %v626_v13 = vadd.f32 %v1180_v53, %v625_v4  ;;  %v594_v29 = vsub.f32 1.0, %v593_v6  ;;  %v653_v19 = vmul.f32 %v1459_v8, %v1430_v49  ;;  %v1194_v28 = vpop.eup %1193  ;;  %vm1499_vm9 = vmor %vm672_vm11, %vm673_vm2  ;;  %v679_v48 = vor.u32 1.1754944e-38, %v678_v7 }
 0x4c4   :  { %v611_v20 = vadd.f32 %v1182_v55, %v610_v9  ;;  %v669_v21 = vsub.f32 1.0, %v668_v12  ;;  %v638_v40 = vmul.f32 %v1194_v28, %v1435_v52  ;;  %vm643_vm13 = vweird.f32 %v1194_v28 }
 0x4c5   :  { %v630_v30 = vsel %vm629_vm15, %v1180_v53, %v626_v13  ;;  %v595_v34 = vmul.f32 %v1188_v62, %v594_v29  ;;  %v654_v35 = vsub.f32 1.0, %v653_v19  ;;  %vm677_vm11 = vcmp.eq.f32.partialorder %v676_v1, 8.507059e+37 }
 0x4c6   :  { %v635_v33 = vsel %vm1440_vm7, %v634_v57, %v630_v30  ;;  %v615_v39 = vsel %vm614_vm0, %v1182_v55, %v611_v20  ;;  %v670_v36 = vmul.f32 %v1454_v3, %v669_v21  ;;  %vm658_vm7 = vweird.f32 %v1459_v8 }
 0x4c7   :  { %724 = vrot.lane.b32.xlu2 %v635_v33, %s1202_s23  ;;  %v620_v45 = vsel %vm1446_vm8, %v619_v0, %v615_v39  ;;  %v596_v46 = vadd.f32 %v1188_v62, %v595_v34  ;;  %v655_v38 = vmul.f32 %v1459_v8, %v654_v35  ;;  %v639_v50 = vsub.f32 1.0, %v638_v40  ;;  %v1196_v60 = vpop.eup %1195 }
 0x4c8   :  { %722 = vrot.lane.b32.xlu1 %v620_v45, %s1202_s23  ;;  %v671_v2 = vadd.f32 %v1454_v3, %v670_v36  ;;  %vm657_vm8 = vweird.f32 %v1430_v49  ;;  %v646_v59 = vand.u32 2147483647, %v1435_v52  ;;  %vm662_vm15 = vcmp.eq.f32.partialorder %v661_v56, 8.507059e+37 }
 0x4c9   :  { %v600_v51 = vsel %vm599_vm5, %v1188_v62, %v596_v46  ;;  %v656_v53 = vadd.f32 %v1459_v8, %v655_v38  ;;  %v640_v41 = vmul.f32 %v1194_v28, %v639_v50  ;;  %vm1509_vm10 = vmor %vm657_vm8, %vm658_vm7  ;;  %v698_v0 = vmul.f32 %v1196_v60, %v1470_v23 }
 0x4ca   :  { %v605_v55 = vsel %vm1461_vm14, %v604_v18, %v600_v51  ;;  %v675_v42 = vsel %vm1499_vm9, %v1454_v3, %v671_v2  ;;  %vm642_vm14 = vweird.f32 %v1435_v52  ;;  %v1198_v3 = vpop.eup %1197  ;;  %v649_v4 = vor.u32 1.1754944e-38, %v648_v43 }
 0x4cb   :  { %720 = vrot.lane.b32.xlu0 %v605_v55, %s1202_s23  ;;  %v660_v58 = vsel %vm1509_vm10, %v1459_v8, %v656_v53  ;;  %v641_v49 = vadd.f32 %v1194_v28, %v640_v41  ;;  %v680_v61 = vsel %vm677_vm11, %v679_v48, %v675_v42  ;;  %vm644_vm1 = vmor %vm642_vm14, %vm643_vm13  ;;  %vm647_vm0 = vcmp.eq.f32.partialorder %v646_v59, 8.507059e+37 }
 0x4cc   :  { %v665_v62 = vsel %vm662_vm15, %v664_v44, %v660_v58  ;;  %v699_v1 = vsub.f32 1.0, %v698_v0  ;;  %v683_v6 = vmul.f32 %v1198_v3, %v1474_v37  ;;  %v708_v52 = vand.u32 2147483648, %v1470_v23  ;;  %v872_v44 = vpop.f32.mrf.mxu2 }
 0x4cd   :  { %v645_v63 = vsel %vm644_vm1, %v1194_v28, %v641_v49  ;;  %vm703_vm2 = vweird.f32 %v1196_v60  ;;  %v706_v9 = vand.u32 2147483647, %v1470_v23  ;;  %vm702_vm5 = vweird.f32 %v1470_v23  ;;  %v1556_v49 = vpop.f32.mrf.mxu1 }
 0x4ce   :  { %v650_v7 = vsel %vm647_vm0, %v649_v4, %v645_v63  ;;  %v700_v8 = vmul.f32 %v1196_v60, %v699_v1  ;;  %v684_v11 = vsub.f32 1.0, %v683_v6  ;;  %v693_v12 = vand.u32 2147483648, %v1474_v37  ;;  %vm704_vm8 = vmor %vm702_vm5, %vm703_vm2 }
 0x4cf   :  { %730 = vrot.lane.b32.xlu2 %v680_v61, %s1202_s23  ;;  %vm688_vm7 = vweird.f32 %v1198_v3  ;;  %v691_v18 = vand.u32 2147483647, %v1474_v37  ;;  %v709_v19 = vor.u32 1.1754944e-38, %v708_v52  ;;  %vm707_vm9 = vcmp.eq.f32.partialorder %v706_v9, 8.507059e+37 }
 0x4d0   :  { %728 = vrot.lane.b32.xlu1 %v665_v62, %s1202_s23  ;;  %v701_v13 = vadd.f32 %v1196_v60, %v700_v8  ;;  %v685_v29 = vmul.f32 %v1198_v3, %v684_v11  ;;  %vm687_vm10 = vweird.f32 %v1474_v37  ;;  %v694_v30 = vor.u32 1.1754944e-38, %v693_v12 }
 0x4d1   :  { %vm689_vm13 = vmor %vm687_vm10, %vm688_vm7  ;;  %vm692_vm11 = vcmp.eq.f32.partialorder %v691_v18, 8.507059e+37  ;;  %vm780_vm14 = vcmask 130048   ;;  %vm1694_vm15 = vcmp.lt.s32.totalorder %v1250_v5, 7  ;;  %vm1695_vm1 = vcmp.lt.s32.totalorder %v1250_v5, 1 }
 0x4d2   :  { %v705_v20 = vsel %vm704_vm8, %v1196_v60, %v701_v13  ;;  %v686_v21 = vadd.f32 %v1198_v3, %v685_v29  ;;  %vm1696_vm0 = vmmov %vm1695_vm1  ;;  %vm1075_vm8 = vcmask 523264  }
 0x4d3   :  { %726 = vrot.lane.b32.xlu0 %v650_v7, %s1202_s23  ;;  %v710_v28 = vsel %vm707_vm9, %v709_v19, %v705_v20  ;;  %vm1697_vm2 = vmmov %vm1696_vm0  ;;  %vm1078_vm9 = vcmask 785408  }
 0x4d4   :  { %v690_v23 = vsel %vm689_vm13, %v1198_v3, %v686_v21  ;;  %v874_v0 = vpop.f32.mrf.mxu2  ;;  %vm1698_vm5 = vmmov %vm1696_vm0 }
 0x4d5   :  { %v695_v34 = vsel %vm692_vm11, %v694_v30, %v690_v23  ;;  %v888_v60 = vpop.f32.mrf.mxu1  ;;  %vm1699_vm7 = vmmov %vm1694_vm15 }
 0x4d7   :  { %734 = vrot.lane.b32.xlu2 %v710_v28, %s1202_s23 }
 0x4d8   :  { %732 = vrot.lane.b32.xlu1 %v695_v34, %s1202_s23 }
 0x521   :  { %v725_v35 = vpop.permute.xlu2 %724 }
 0x522   :  { %v746_v53 = vmul.f32 %v725_v35, %v1403_v17  ;;  %v1111_v17 = vld [vmem:[%s1660_s3] sm:$0xf] }
 0x529   :  { %v731_v45 = vpop.permute.xlu2 %730 }
 0x52a   :  { %v749_v38 = vmul.f32 %v731_v45, %v1409_v26 }
 0x53a   :  { %v723_v33 = vpop.permute.xlu1 %722 }
 0x53b   :  { %v745_v39 = vmul.f32 %v723_v33, %v1401_v16 }
 0x53d   :  { %v721_v36 = vpop.permute.xlu0 %720 }
 0x53e   :  { %v744_v40 = vmul.f32 %v721_v36, %v1399_v14  ;;  %v735_v14 = vpop.permute.xlu2 %734 }
 0x53f   :  { %v751_v47 = vmul.f32 %v735_v14, %v1417_v31  ;;  %v1113_v31 = vld [vmem:[%s1660_s3 + $0x8] sm:$0xf0] }
 0x540   :  { %v754_v46 = vpack.c.bf16 %v745_v39, %v744_v40 }
 0x542   :  { %762 = vrot.lane.b32.xlu0 %v754_v46, %s1207_s11  ;;  %v729_v37 = vpop.permute.xlu1 %728 }
 0x543   :  { %v748_v2 = vmul.f32 %v729_v37, %v1407_v25  ;;  %v1128_v25 = vld [vmem:[%s1660_s3 + $0x4] sm:$0xf] }
 0x545   :  { %v756_v50 = vpack.c.bf16 %v749_v38, %v748_v2  ;;  %v727_v51 = vpop.permute.xlu0 %726 }
 0x546   :  { %v747_v54 = vmul.f32 %v727_v51, %v1405_v24  ;;  %v1129_v24 = vld [vmem:[%s1660_s3 + $0x4] sm:$0xf0] }
 0x547   :  { %766 = vrot.lane.b32.xlu1 %v756_v50, %s1207_s11  ;;  %v1112_v41 = vor.u32 %v1129_v24, %v1111_v17 }
 0x548   :  { %v755_v16 = vpack.c.bf16 %v747_v54, %v746_v53 }
 0x549   :  { %800 = vmatpush.bf16.msra.mxu3 %v1112_v41 }
 0x54a   :  { %764 = vrot.lane.b32.xlu0 %v755_v16, %s1207_s11  ;;  %v733_v55 = vpop.permute.xlu1 %732 }
 0x54b   :  { %v750_v56 = vmul.f32 %v733_v55, %v1419_v32  ;;  %v1116_v32 = vor.u32 %v1128_v25, %v1113_v31 }
 0x54d   :  { %v757_v26 = vpack.c.bf16 %v751_v47, %v750_v56  ;;  %829 = vmatpush.bf16.msra.mxu0 %v1116_v32 }
 0x54f   :  { %768 = vrot.lane.b32.xlu2 %v757_v26, %s1207_s11 }
 0x5a9   :  { %v769_v58 = vpop.permute.xlu2 %768 }
 0x5b4   :  { %v763_v42 = vpop.permute.xlu0 %762 }
 0x5b5   :  { %1117 = vmatmul.msk.bf16.vlgmr.msra.gmra.mxu3 %vm780_vm14, %v763_v42  ;;  %1121 = vmatmul.msk.bf16.vlgmr.msra.gmra.mxu0 %vm780_vm14, %v763_v42 }
 0x5b9   :  { %v767_v48 = vpop.permute.xlu1 %766 }
 0x5bc   :  { %v765_v57 = vpop.permute.xlu0 %764 }
 0x5c5   :  { %1118 = vmatmul.msk.bf16.gmra.mxu3 %vm780_vm14, %v765_v57  ;;  %1122 = vmatmul.msk.bf16.gmra.mxu0 %vm780_vm14, %v765_v57 }
 0x5d5   :  { %1119 = vmatmul.msk.bf16.gmra.mxu3 %vm780_vm14, %v767_v48  ;;  %1123 = vmatmul.msk.bf16.gmra.mxu0 %vm780_vm14, %v767_v48 }
 0x5e5   :  { %1120 = vmatmul.msk.bf16.gmra.mxu3 %vm780_vm14, %v769_v58  ;;  %1124 = vmatmul.msk.bf16.gmra.mxu0 %vm780_vm14, %v769_v58 }
 0x632   :  { %v831_v43 = vpop.f32.mrf.mxu0 }
 0x633   :  { %v986_v54 = vadd.f32 %v1556_v49, %v831_v43 }
 0x638   :  { %v802_v59 = vpop.f32.mrf.mxu3 }
 0x639   :  { %v1558_v63 = vadd.f32 %v872_v44, %v802_v59 }
 0x63a   :  { %v833_v61 = vpop.f32.mrf.mxu0 }
 0x63b   :  { %v987_v62 = vadd.f32 %v888_v60, %v833_v61  ;;  %v994_v6 = vrot.slane %v1558_v63, 1 }
 0x640   :  { %v804_v3 = vpop.f32.mrf.mxu3 }
 0x641   :  { %v1560_v4 = vadd.f32 %v874_v0, %v804_v3 }
 0x642   :  { %v1562_v1 = vpop.f32.mrf.mxu0 }
 0x643   :  { %v995_v7 = vrot.slane %v1560_v4, 1 }
 0x645   :  { %v1572_v52 = vsel %vm1694_vm15, %v995_v7, %v994_v6  ;;  %v996_v59 = vsel %vm1699_vm7, %v994_v6, %v995_v7 }
 0x646   :  { %v998_v3 = vsel %vm1254_vm3, 0.0, %v996_v59 }
 0x648   :  { %v807_v8 = vpop.f32.mrf.mxu3 }
 0x649   :  { %v894_v9 = vadd.f32 %v872_v44, %v807_v8 }
 0x64a   :  { %v838_v11 = vpop.f32.mrf.mxu0 }
 0x64b   :  { %v1574_v12 = vadd.f32 %v888_v60, %v838_v11  ;;  %898 = vrot.lane.b32.xlu2 %v894_v9, %s1200_s0 }
 0x650   :  { %v809_v13 = vpop.f32.mrf.mxu3 }
 0x651   :  { %v895_v38 = vadd.f32 %v874_v0, %v809_v13  ;;  %v999_v13 = vsel %vm1264_vm4, 0.0, %v1572_v52 }
 0x652   :  { %v841_v29 = vpop.f32.mrf.mxu0 }
 0x653   :  { %v918_v56 = vadd.f32 %v1556_v49, %v841_v29 }
 0x658   :  { %v812_v18 = vpop.f32.mrf.mxu3 }
 0x659   :  { %v906_v34 = vadd.f32 %v872_v44, %v812_v18 }
 0x65a   :  { %v843_v19 = vpop.f32.mrf.mxu0 }
 0x65b   :  { %v919_v20 = vadd.f32 %v888_v60, %v843_v19 }
 0x660   :  { %v814_v21 = vpop.f32.mrf.mxu3 }
 0x661   :  { %v907_v28 = vadd.f32 %v874_v0, %v814_v21 }
 0x662   :  { %v846_v30 = vpop.f32.mrf.mxu0 }
 0x663   :  { %912 = vrot.lane.b32.xlu2 %v907_v28, %s1206_s10  ;;  %v963_v35 = vadd.f32 %v1556_v49, %v846_v30 }
 0x665   :  { %v965_v40 = vrot.slane %v963_v35, 7 }
 0x668   :  { %v817_v23 = vpop.f32.mrf.mxu3 }
 0x669   :  { %v920_v33 = vadd.f32 %v872_v44, %v817_v23 }
 0x66a   :  { %v848_v39 = vpop.f32.mrf.mxu0 }
 0x66b   :  { %v964_v36 = vadd.f32 %v888_v60, %v848_v39  ;;  %1006 = vrot.lane.b32.xlu2 %v906_v34, %s1200_s0  ;;  %924 = vrot.lane.b32.xlu0 %v920_v33, %s1200_s0 }
 0x66d   :  { %v966_v45 = vrot.slane %v964_v36, 7 }
 0x66f   :  { %v968_v46 = vsel %vm1695_vm1, %v966_v45, %v965_v40  ;;  %v967_v51 = vsel %vm1696_vm0, %v965_v40, %v966_v45 }
 0x670   :  { %v819_v37 = vpop.f32.mrf.mxu3  ;;  %v969_v50 = vsel %vm1274_vm6, 0.0, %v968_v46  ;;  %v970_v53 = vsel %vm1683_vm12, 0.0, %v967_v51 }
 0x671   :  { %v921_v2 = vadd.f32 %v874_v0, %v819_v37 }
 0x673   :  { %973 = vrot.lane.b32.xlu2 %v969_v50, %s1207_s11  ;;  %900 = vrot.lane.b32.xlu0 %v895_v38, %s1200_s0 }
 0x674   :  { %926 = vrot.lane.b32.xlu1 %v921_v2, %s1200_s0 }
 0x67b   :  { %955 = vrot.lane.b32.xlu0 %v920_v33, %s1207_s11 }
 0x67c   :  { %910 = vrot.lane.b32.xlu1 %v906_v34, %s1206_s10 }
 0x683   :  { %1008 = vrot.lane.b32.xlu0 %v907_v28, %s1200_s0 }
 0x684   :  { %1014 = vrot.lane.b32.xlu1 %v920_v33, %s1206_s10 }
 0x68b   :  { %975 = vrot.lane.b32.xlu0 %v970_v53, %s1207_s11 }
 0x68c   :  { %957 = vrot.lane.b32.xlu1 %v921_v2, %s1207_s11 }
 0x6a5   :  { %v899_v16 = vpop.permute.xlu2 %898 }
 0x6a6   :  { %v904_v14 = vadd.f32 %v899_v16, %v1558_v63  ;;  %v988_v55 = vadd.f32 %v986_v54, %v899_v16 }
 0x6a8   :  { %1024 = vrot.lane.b32.xlu1 %v904_v14, %s1207_s11 }
 0x6bd   :  { %v913_v7 = vpop.permute.xlu2 %912 }
 0x6c5   :  { %v1007_v18 = vpop.permute.xlu2 %1006 }
 0x6dd   :  { %v925_v47 = vpop.permute.xlu0 %924 }
 0x6de   :  { %v930_v26 = vadd.f32 %v925_v47, %v918_v56 }
 0x6e0   :  { %v932_v32 = vrot.slane %v930_v26, 7 }
 0x6e5   :  { %v901_v17 = vpop.permute.xlu0 %900 }
 0x6e6   :  { %v905_v24 = vadd.f32 %v901_v17, %v1560_v4  ;;  %v989_v25 = vadd.f32 %v987_v62, %v901_v17  ;;  %v927_v41 = vpop.permute.xlu1 %926 }
 0x6e7   :  { %v931_v31 = vadd.f32 %v927_v41, %v919_v20  ;;  %v974_v20 = vpop.permute.xlu2 %973 }
 0x6e8   :  { %1026 = vrot.lane.b32.xlu2 %v905_v24, %s1207_s11  ;;  %v991_v8 = vadd.f32 %v989_v25, %v913_v7  ;;  %v917_v35 = vadd.f32 %v913_v7, %v905_v24 }
 0x6e9   :  { %v933_v42 = vrot.slane %v931_v31, 7 }
 0x6eb   :  { %v935_v57 = vsel %vm1697_vm2, %v933_v42, %v932_v32  ;;  %v934_v48 = vsel %vm1698_vm5, %v932_v32, %v933_v42 }
 0x6ec   :  { %v936_v58 = vsel %vm1274_vm6, 0.0, %v935_v57  ;;  %v937_v43 = vsel %vm1683_vm12, 0.0, %v934_v48  ;;  %vm1700_vm6 = vmmov %vm1699_vm7 }
 0x6ed   :  { %940 = vrot.lane.b32.xlu0 %v936_v58, %s1206_s10  ;;  %942 = vrot.lane.b32.xlu1 %v937_v43, %s1206_s10  ;;  %v956_v62 = vpop.permute.xlu0 %955  ;;  %vm1701_vm12 = vmmov %vm1700_vm6 }
 0x6ee   :  { %v911_v44 = vpop.permute.xlu1 %910 }
 0x6ef   :  { %v916_v60 = vadd.f32 %v911_v44, %v904_v14  ;;  %v990_v61 = vadd.f32 %v988_v55, %v911_v44  ;;  %v1004_v55 = vadd.f32 %v1556_v49, %v1562_v1 }
 0x6f0   :  { %1016 = vrot.lane.b32.xlu2 %v921_v2, %s1206_s10 }
 0x6f1   :  { %v961_v27 = vadd.f32 %v956_v62, %v916_v60  ;;  %v992_v0 = vadd.f32 %v990_v61, %v956_v62  ;;  %v1012_v26 = vadd.f32 %v1007_v18, %v1004_v55 }
 0x6f3   :  { %v1000_v4 = vadd.f32 %v998_v3, %v992_v0  ;;  %v979_v37 = vadd.f32 %v974_v20, %v961_v27 }
 0x6f5   :  { %950 = vrot.lane.b32.xlu0 %v1141_v22, %s1206_s10  ;;  %981 = vrot.lane.b32.xlu1 %v1141_v22, %s1207_s11  ;;  %v1002_v6 = vadd.f32 %v1141_v22, %v1000_v4  ;;  %v1009_v19 = vpop.permute.xlu0 %1008 }
 0x6f6   :  { %v1015_v63 = vpop.permute.xlu1 %1014  ;;  %v1013_v45 = vadd.f32 %v1009_v19, %v1574_v12 }
 0x6f7   :  { %v1020_v31 = vadd.f32 %v1015_v63, %v1012_v26 }
 0x6fd   :  { %1058 = vrot.lane.b32.xlu0 %v1002_v6, %s1206_s10  ;;  %v976_v21 = vpop.permute.xlu0 %975 }
 0x6fe   :  { %v958_v9 = vpop.permute.xlu1 %957 }
 0x6ff   :  { %v993_v11 = vadd.f32 %v991_v8, %v958_v9  ;;  %v962_v33 = vadd.f32 %v958_v9, %v917_v35 }
 0x701   :  { %v1001_v29 = vadd.f32 %v999_v13, %v993_v11  ;;  %v980_v38 = vadd.f32 %v976_v21, %v962_v33 }
 0x703   :  { %v1003_v41 = vadd.f32 %v1141_v22, %v1001_v29 }
 0x71a   :  { %v1025_v28 = vpop.permute.xlu1 %1024 }
 0x71b   :  { %v1030_v36 = vrot.slane %v1025_v28, 1 }
 0x742   :  { %v1027_v30 = vpop.permute.xlu2 %1026 }
 0x743   :  { %v1031_v39 = vrot.slane %v1027_v30, 1 }
 0x745   :  { %v1033_v52 = vsel %vm1700_vm6, %v1031_v39, %v1030_v36  ;;  %v1032_v47 = vsel %vm1701_vm12, %v1030_v36, %v1031_v39 }
 0x746   :  { %v1035_v14 = vsel %vm1264_vm4, 0.0, %v1033_v52  ;;  %v1034_v25 = vsel %vm1254_vm3, 0.0, %v1032_v47  ;;  %vm1072_vm4 = vcmask 261120  }
 0x747   :  { %v1036_v15 = vadd.f32 %v1034_v25, %v1020_v31 }
 0x749   :  { %v1038_v49 = vadd.f32 %v1141_v22, %v1036_v15 }
 0x74a   :  { %v1017_v40 = vpop.permute.xlu2 %1016 }
 0x74b   :  { %v1021_v51 = vadd.f32 %v1017_v40, %v1013_v45 }
 0x74d   :  { %v1037_v12 = vadd.f32 %v1035_v14, %v1021_v51 }
 0x74f   :  { %v1039_v24 = vadd.f32 %v1141_v22, %v1037_v12 }
 0x75f   :  { %v941_v23 = vpop.permute.xlu0 %940  ;;  %v943_v34 = vpop.permute.xlu1 %942 }
 0x760   :  { %v947_v46 = vadd.f32 %v943_v34, %v917_v35  ;;  %v946_v56 = vadd.f32 %v941_v23, %v916_v60 }
 0x767   :  { %v951_v2 = vpop.permute.xlu0 %950  ;;  %v982_v50 = vpop.permute.xlu1 %981 }
 0x768   :  { %v954_v53 = vadd.f32 %v951_v2, %v947_v46  ;;  %v984_v54 = vadd.f32 %v982_v50, %v979_v37  ;;  %v985_v16 = vadd.f32 %v982_v50, %v980_v38  ;;  %v953_v17 = vadd.f32 %v951_v2, %v946_v56 }
 0x76a   :  { %1044 = vrot.lane.b32.xlu0 %v954_v53, %s1206_s10  ;;  %1052 = vrot.lane.b32.xlu2 %v985_v16, %s1206_s10 }
 0x76b   :  { %1050 = vrot.lane.b32.xlu1 %v984_v54, %s1206_s10 }
 0x76f   :  { %v1059_v1 = vpop.permute.xlu0 %1058 }
 0x772   :  { %1068 = vrot.lane.b32.xlu0 %v1039_v24, %s1207_s11  ;;  %1042 = vrot.lane.b32.xlu2 %v953_v17, %s1206_s10 }
 0x773   :  { %1060 = vrot.lane.b32.xlu1 %v1003_v41, %s1206_s10 }
 0x77a   :  { %1066 = vrot.lane.b32.xlu2 %v1038_v49, %s1207_s11 }
 0x7c4   :  { %v1053_v5 = vpop.permute.xlu2 %1052 }
 0x7cc   :  { %v1043_v32 = vpop.permute.xlu2 %1042 }
 0x7d4   :  { %v1067_v48 = vpop.permute.xlu2 %1066 }
 0x7dc   :  { %v1045_v42 = vpop.permute.xlu0 %1044 }
 0x7dd   :  { %v1051_v10 = vpop.permute.xlu1 %1050  ;;  %v1074_v60 = vsel %vm1072_vm4, %v1045_v42, %v1053_v5 }
 0x7de   :  { %v1073_v57 = vsel %vm1072_vm4, %v1043_v32, %v1051_v10 }
 0x7df   :  { %v1076_v58 = vsel %vm1075_vm8, %v1073_v57, %v1059_v1 }
 0x7e0   :  { %v1079_v43 = vsel %vm1078_vm9, %v1076_v58, %v1067_v48 }
 0x7e1   :  { %v1081_v44 = vmax.f32 %v1079_v43, -80.0 }
 0x7e3   :  { %1083 = vst [vmem:[%s1661_s5] sm:$0xff] %v1081_v44 }
 0x7e4   :  { %v1069_v59 = vpop.permute.xlu0 %1068 }
 0x7e5   :  { %v1061_v61 = vpop.permute.xlu1 %1060 }
 0x7e6   :  { %v1077_v62 = vsel %vm1075_vm8, %v1074_v60, %v1061_v61 }
 0x7e7   :  { %v1080_v22 = vsel %vm1078_vm9, %v1077_v62, %v1069_v59 }
 0x7e8   :  { %v1082_v27 = vmax.f32 %v1080_v22, -80.0 }
 0x7ea   :  { %1084 = vst [vmem:[%s1661_s5 + $0x8] sm:$0xff] %v1082_v27 }

</bundles_post_ra>
